<compile_context>
chip_gen: v7x
topology: tpu7x:2x2x1
jax: 0.10.0
libtpu: 0.0.40
codegen_flags: <defaults>
</compile_context>

<pallas_src>
import functools
import math

import jax
import jax.numpy as jnp
from jax.experimental import pallas as pl
from jax.experimental.pallas import tpu as pltpu


# ----------------------------- kernel helpers ------------------------------

def _layernorm(x, gamma, beta, eps=1e-5):
    mean = jnp.mean(x, axis=-1, keepdims=True)
    var = jnp.mean((x - mean) ** 2, axis=-1, keepdims=True)
    return (x - mean) * jax.lax.rsqrt(var + eps) * gamma + beta


def _gelu_exact(x):
    # torch.nn.GELU default: 0.5 * x * (1 + erf(x / sqrt(2)))
    return 0.5 * x * (1.0 + jax.lax.erf(x * (1.0 / math.sqrt(2.0))))


# --------------------------------- kernel ----------------------------------

def encoder_kernel(x_ref,
                   g1_ref, be1_ref,
                   wqkv_ref, bqkv_ref,
                   wo_ref, bo_ref,
                   g2_ref, be2_ref,
                   wm1_ref, bm1_ref, wm2_ref, bm2_ref,
                   out_ref,
                   *, head: int, hidden: int, bb: int, seq: int,
                   out_transposed: bool):
    H = hidden
    dh = H // head
    rows = bb * seq

    # --- fused input permute: (bb, H, S) -> (bb*S, H); hidden on lanes -------
    if bb == 1:
        x = x_ref[0].T.astype(jnp.float32)                       # (S, H)
    else:
        x = jnp.concatenate([x_ref[b].T for b in range(bb)],
                            axis=0).astype(jnp.float32)          # (rows, H)

    # --- LayerNorm 1 (f32) ---------------------------------------------------
    xn = _layernorm(x, g1_ref[...], be1_ref[...])

    # --- fused q/k/v projection: one bf16 MXU pass, f32 accumulation ---------
    # (1/sqrt(hidden_dim) already folded into the wq/bq columns of wqkv/bqkv.)
    qkv = jnp.dot(xn.astype(jnp.bfloat16), wqkv_ref[...],
                  preferred_element_type=jnp.float32) + bqkv_ref[...]

    # single bf16 cast for all heads
    q3 = qkv[:, 0 * H:1 * H].astype(jnp.bfloat16).reshape(bb, seq, H)
    k3 = qkv[:, 1 * H:2 * H].astype(jnp.bfloat16).reshape(bb, seq, H)
    v3 = qkv[:, 2 * H:3 * H].astype(jnp.bfloat16).reshape(bb, seq, H)

    # --- attention: static head loop, batched over the bb batch elements -----
    # No per-head masked scratch stores: collect head outputs and concatenate
    # once along the lane-dense hidden axis.
    heads_out = []
    for h in range(head):
        sl = slice(h * dh, (h + 1) * dh)
        s = jnp.einsum('bqd,bkd->bqk', q3[..., sl], k3[..., sl],
                       preferred_element_type=jnp.float32)       # (bb, S, S)
        s = s - jnp.max(s, axis=-1, keepdims=True)
        p = jnp.exp(s)
        p = p * pl.reciprocal(jnp.sum(p, axis=-1, keepdims=True), approx=True)
        heads_out.append(
            jnp.einsum('bqk,bkd->bqd', p.astype(jnp.bfloat16), v3[..., sl],
                       preferred_element_type=jnp.float32))      # (bb, S, dh)
    attn = jnp.concatenate(heads_out, axis=-1).reshape(rows, H)  # (rows, H)

    # --- output projection + residual 1 (dropout p=0 -> identity) ------------
    o = jnp.dot(attn.astype(jnp.bfloat16), wo_ref[...],
                preferred_element_type=jnp.float32) + bo_ref[...]
    out1 = o + x

    # --- LayerNorm 2 + MLP (GELU after BOTH linears, per the module) ---------
    yn = _layernorm(out1, g2_ref[...], be2_ref[...])
    h1 = _gelu_exact(jnp.dot(yn.astype(jnp.bfloat16), wm1_ref[...],
                             preferred_element_type=jnp.float32) + bm1_ref[...])
    h2 = _gelu_exact(jnp.dot(h1.astype(jnp.bfloat16), wm2_ref[...],
                             preferred_element_type=jnp.float32) + bm2_ref[...])
    y = h2 + out1                                                # (rows, H) f32

    if out_transposed:
        # fused output permute: write (bb, H, S) slabs directly
        for b in range(bb):
            out_ref[b] = y[b * seq:(b + 1) * seq, :].T.astype(out_ref.dtype)
    else:
        out_ref[...] = y.reshape(bb, seq, H).astype(out_ref.dtype)


# ------------------------- one-time parameter prep ---------------------------

def prepare_encoder_params(params, weight_dtype=jnp.bfloat16):
    """Hoisted out of the per-layer call: qkv concat, scale folding, casts."""
    H = params["wq"].shape[0]
    scale = 1.0 / (H ** 0.5)   # module divides scores by sqrt(hidden_dim)
    wqkv = jnp.concatenate(
        [params["wq"] * scale, params["wk"], params["wv"]],
        axis=1).astype(weight_dtype)
    bqkv = jnp.concatenate(
        [params["bq"] * scale, params["bk"], params["bv"]],
        axis=1).astype(jnp.float32)
    return (
        params["g1"].astype(jnp.float32), params["be1"].astype(jnp.float32),
        wqkv, bqkv,
        params["wo"].astype(weight_dtype), params["bo"].astype(jnp.float32),
        params["g2"].astype(jnp.float32), params["be2"].astype(jnp.float32),
        params["wm1"].astype(weight_dtype), params["bm1"].astype(jnp.float32),
        params["wm2"].astype(weight_dtype), params["bm2"].astype(jnp.float32),
    )


# -------------------------------- wrapper -----------------------------------

def _tpu_generation():
    try:
        return jax.devices()[0].device_kind.lower()
    except Exception:
        return ""


def transformer_encoder(x, prepared, *, head: int, is_last_encoder: bool,
                        batch_block: int | None = None):
    """x: [batch, hidden_dim, seqlen] (same layout as the PyTorch module)."""
    B, H, S = x.shape
    assert H % head == 0

    kind = _tpu_generation()
    is_v7 = "v7" in kind
    if is_v7:
        vmem_limit = 44 * 1024 * 1024          # 64 MiB physical per TC
        rows_target = 256
    elif ("v5" in kind) or ("v6" in kind):
        vmem_limit = 96 * 1024 * 1024          # 128 MiB physical
        rows_target = 512
    else:
        vmem_limit = 64 * 1024 * 1024
        rows_target = 512

    # batch block: make the matmul M dim (bb*S) tall, but keep >=2 grid steps
    # on v7x so both TensorCores get a tile.
    if batch_block is None:
        bb = max(1, min(B, max(1, rows_target // max(S, 1))))
        while B % bb:
            bb -= 1
        if is_v7 and B >= 2 and B // bb < 2:
            bb2 = B // 2
            while bb2 > 1 and B % bb2:
                bb2 -= 1
            bb = max(1, bb2)
    else:
        bb = batch_block
    assert B % bb == 0

    # weights/biases: whole-array resident in VMEM, single buffer (their index
    # never changes across the grid, so no double-buffering is needed).
    weight_spec = pl.BlockSpec(memory_space=pltpu.MemorySpace.VMEM)
    in_specs = [pl.BlockSpec((bb, H, S), lambda i: (i, 0, 0))] + \
               [weight_spec] * len(prepared)

    if is_last_encoder:
        out_shape = jax.ShapeDtypeStruct((B, S, H), x.dtype)
        out_spec = pl.BlockSpec((bb, S, H), lambda i: (i, 0, 0))
        out_transposed = False
    else:
        out_shape = jax.ShapeDtypeStruct((B, H, S), x.dtype)
        out_spec = pl.BlockSpec((bb, H, S), lambda i: (i, 0, 0))
        out_transposed = True

    out = pl.pallas_call(
        functools.partial(encoder_kernel, head=head, hidden=H, bb=bb, seq=S,
                          out_transposed=out_transposed),
        out_shape=out_shape,
        grid_spec=pltpu.PrefetchScalarGridSpec(
            num_scalar_prefetch=0,
            grid=(B // bb,),
            in_specs=in_specs,
            out_specs=out_spec,
        ),
        compiler_params=pltpu.CompilerParams(
            dimension_semantics=("parallel",),
            vmem_limit_bytes=vmem_limit,
        ),
    )(x, *prepared)

    if is_last_encoder:
        return out[:, 0]                        # [B, H]
    return out                                  # [B, H, S] (already permuted)


# --------------------------- pure-JAX reference ------------------------------

def reference(x, params, *, head: int, is_last_encoder: bool):
    B, H, S = x.shape
    xs = jnp.transpose(x, (0, 2, 1)).astype(jnp.float32)   # [B, S, H]
    dh = H // head

    xn = _layernorm(xs, params["g1"], params["be1"])
    q = xn @ params["wq"] + params["bq"]
    k = xn @ params["wk"] + params["bk"]
    v = xn @ params["wv"] + params["bv"]
    q = q.reshape(B, S, head, dh).transpose(0, 2, 1, 3)
    k = k.reshape(B, S, head, dh).transpose(0, 2, 1, 3)
    v = v.reshape(B, S, head, dh).transpose(0, 2, 1, 3)
    score = jax.nn.softmax(jnp.einsum("bhif,bhjf->bhij", q, k) / (H ** 0.5), axis=-1)
    attn = jnp.einsum("bhij,bhjf->bihf", score, v).reshape(B, S, H)
    o = attn @ params["wo"] + params["bo"]
    out1 = o + xs

    yn = _layernorm(out1, params["g2"], params["be2"])
    h1 = _gelu_exact(yn @ params["wm1"] + params["bm1"])
    h2 = _gelu_exact(h1 @ params["wm2"] + params["bm2"])
    out = h2 + out1

    if is_last_encoder:
        return out[:, 0]
    return jnp.transpose(out, (0, 2, 1))


# ----------------------------------- main ------------------------------------

if __name__ == "__main__":
    B, H, S = 2, 32, 8          # batch, hidden_dim, seqlen
    HEAD, MLP = 4, 64
    IS_LAST = False

    key = jax.random.PRNGKey(0)
    keys = jax.random.split(key, 13)

    def lin(k, shape):
        return (0.02 * jax.random.normal(k, shape)).astype(jnp.float32)

    params = {
        "g1": jnp.ones((1, H), jnp.float32), "be1": jnp.zeros((1, H), jnp.float32),
        "wq": lin(keys[0], (H, H)), "bq": lin(keys[1], (1, H)),
        "wk": lin(keys[2], (H, H)), "bk": lin(keys[3], (1, H)),
        "wv": lin(keys[4], (H, H)), "bv": lin(keys[5], (1, H)),
        "wo": lin(keys[6], (H, H)), "bo": lin(keys[7], (1, H)),
        "g2": jnp.ones((1, H), jnp.float32), "be2": jnp.zeros((1, H), jnp.float32),
        "wm1": lin(keys[8], (H, MLP)), "bm1": lin(keys[9], (1, MLP)),
        "wm2": lin(keys[10], (MLP, H)), "bm2": lin(keys[11], (1, H)),
    }
    prepared = prepare_encoder_params(params)     # one-time weight prep

    x = jax.random.normal(keys[12], (B, H, S), dtype=jnp.float32)

    out = transformer_encoder(x, prepared, head=HEAD, is_last_encoder=IS_LAST)
    out = jax.block_until_ready(out)

    ref = reference(x, params, head=HEAD, is_last_encoder=IS_LAST)
    assert out.shape == ref.shape, (out.shape, ref.shape)
    # bf16 matmuls + approx reciprocal -> relaxed tolerance vs the f32 reference
    assert jnp.allclose(out, ref, atol=1e-2, rtol=1e-2), \
        float(jnp.max(jnp.abs(out - ref)))

    # also exercise the is_last_encoder=True path ([B, H] output)
    out_last = jax.block_until_ready(
        transformer_encoder(x, prepared, head=HEAD, is_last_encoder=True))
    ref_last = reference(x, params, head=HEAD, is_last_encoder=True)
    assert out_last.shape == (B, H)
    assert jnp.allclose(out_last, ref_last, atol=1e-2, rtol=1e-2)

    print("KERNEL_OK")
</pallas_src>

<mosaic_0001>
module attributes {stable_mosaic.version = 11 : i64} {
  func.func @encoder_kernel(%arg0: i32, %arg1: memref<2x32x8xf32, #tpu.memory_space<vmem>>, %arg2: memref<1x32xf32, #tpu.memory_space<vmem>>, %arg3: memref<1x32xf32, #tpu.memory_space<vmem>>, %arg4: memref<32x96xbf16, #tpu.memory_space<vmem>>, %arg5: memref<1x96xf32, #tpu.memory_space<vmem>>, %arg6: memref<32x32xbf16, #tpu.memory_space<vmem>>, %arg7: memref<1x32xf32, #tpu.memory_space<vmem>>, %arg8: memref<1x32xf32, #tpu.memory_space<vmem>>, %arg9: memref<1x32xf32, #tpu.memory_space<vmem>>, %arg10: memref<32x64xbf16, #tpu.memory_space<vmem>>, %arg11: memref<1x64xf32, #tpu.memory_space<vmem>>, %arg12: memref<64x32xbf16, #tpu.memory_space<vmem>>, %arg13: memref<1x32xf32, #tpu.memory_space<vmem>>, %arg14: memref<2x32x8xf32, #tpu.memory_space<vmem>>) attributes {dimension_semantics = [#tpu.dimension_semantics<parallel>], iteration_bounds = array<i64: 1>, scalar_prefetch = 0 : i64, scratch_operands = 0 : i64, tpu.core_type = #tpu.core_type<tc>, window_params = [{transform_indices = @transform_0, window_bounds = array<i64: 2, 32, 8>}, {pipeline_mode = #tpu.pipeline_mode<synchronous>, transform_indices = @transform_1, window_bounds = array<i64: 1, 32>}, {pipeline_mode = #tpu.pipeline_mode<synchronous>, transform_indices = @transform_2, window_bounds = array<i64: 1, 32>}, {pipeline_mode = #tpu.pipeline_mode<synchronous>, transform_indices = @transform_3, window_bounds = array<i64: 32, 96>}, {pipeline_mode = #tpu.pipeline_mode<synchronous>, transform_indices = @transform_4, window_bounds = array<i64: 1, 96>}, {pipeline_mode = #tpu.pipeline_mode<synchronous>, transform_indices = @transform_5, window_bounds = array<i64: 32, 32>}, {pipeline_mode = #tpu.pipeline_mode<synchronous>, transform_indices = @transform_6, window_bounds = array<i64: 1, 32>}, {pipeline_mode = #tpu.pipeline_mode<synchronous>, transform_indices = @transform_7, window_bounds = array<i64: 1, 32>}, {pipeline_mode = #tpu.pipeline_mode<synchronous>, transform_indices = @transform_8, window_bounds = array<i64: 1, 32>}, {pipeline_mode = #tpu.pipeline_mode<synchronous>, transform_indices = @transform_9, window_bounds = array<i64: 32, 64>}, {pipeline_mode = #tpu.pipeline_mode<synchronous>, transform_indices = @transform_10, window_bounds = array<i64: 1, 64>}, {pipeline_mode = #tpu.pipeline_mode<synchronous>, transform_indices = @transform_11, window_bounds = array<i64: 64, 32>}, {pipeline_mode = #tpu.pipeline_mode<synchronous>, transform_indices = @transform_12, window_bounds = array<i64: 1, 32>}, {transform_indices = @transform_13, window_bounds = array<i64: 2, 32, 8>}]} {
    %c0 = arith.constant 0 : index
    %c0_0 = arith.constant 0 : index
    %c0_1 = arith.constant 0 : index
    %0 = vector.load %arg1[%c0, %c0_0, %c0_1] : memref<2x32x8xf32, #tpu.memory_space<vmem>>, vector<1x32x8xf32>
    %1 = vector.shape_cast %0 : vector<1x32x8xf32> to vector<32x8xf32>
    %2 = tpu.transpose %1, [1, 0] : vector<32x8xf32> -> vector<8x32xf32>
    %c1 = arith.constant 1 : index
    %c0_2 = arith.constant 0 : index
    %c0_3 = arith.constant 0 : index
    %3 = vector.load %arg1[%c1, %c0_2, %c0_3] : memref<2x32x8xf32, #tpu.memory_space<vmem>>, vector<1x32x8xf32>
    %4 = vector.shape_cast %3 : vector<1x32x8xf32> to vector<32x8xf32>
    %5 = tpu.transpose %4, [1, 0] : vector<32x8xf32> -> vector<8x32xf32>
    %6 = tpu.concatenate %2, %5 in 0 : vector<8x32xf32>, vector<8x32xf32> -> vector<16x32xf32>
    %c0_4 = arith.constant 0 : index
    %c0_5 = arith.constant 0 : index
    %7 = vector.load %arg2[%c0_4, %c0_5] : memref<1x32xf32, #tpu.memory_space<vmem>>, vector<1x32xf32>
    %c0_6 = arith.constant 0 : index
    %c0_7 = arith.constant 0 : index
    %8 = vector.load %arg3[%c0_6, %c0_7] : memref<1x32xf32, #tpu.memory_space<vmem>>, vector<1x32xf32>
    %cst = arith.constant dense<0.000000e+00> : vector<16xf32>
    %9 = vector.multi_reduction <add>, %6, %cst [1] : vector<16x32xf32> to vector<16xf32>
    %10 = vector.shape_cast %9 : vector<16xf32> to vector<16x1xf32>
    %cst_8 = arith.constant 3.200000e+01 : f32
    %11 = vector.broadcast %cst_8 : f32 to vector<16x1xf32>
    %12 = arith.divf %10, %11 : vector<16x1xf32>
    %13 = vector.broadcast %12 : vector<16x1xf32> to vector<16x32xf32>
    %14 = arith.subf %6, %13 : vector<16x32xf32>
    %15 = arith.mulf %14, %14 : vector<16x32xf32>
    %cst_9 = arith.constant dense<0.000000e+00> : vector<16xf32>
    %16 = vector.multi_reduction <add>, %15, %cst_9 [1] : vector<16x32xf32> to vector<16xf32>
    %17 = vector.shape_cast %16 : vector<16xf32> to vector<16x1xf32>
    %cst_10 = arith.constant 3.200000e+01 : f32
    %18 = vector.broadcast %cst_10 : f32 to vector<16x1xf32>
    %19 = arith.divf %17, %18 : vector<16x1xf32>
    %20 = vector.broadcast %12 : vector<16x1xf32> to vector<16x32xf32>
    %21 = arith.subf %6, %20 : vector<16x32xf32>
    %cst_11 = arith.constant 9.99999974E-6 : f32
    %22 = vector.broadcast %cst_11 : f32 to vector<16x1xf32>
    %23 = arith.addf %19, %22 : vector<16x1xf32>
    %24 = math.rsqrt %23 : vector<16x1xf32>
    %25 = vector.broadcast %24 : vector<16x1xf32> to vector<16x32xf32>
    %26 = arith.mulf %21, %25 : vector<16x32xf32>
    %27 = vector.broadcast %7 : vector<1x32xf32> to vector<16x32xf32>
    %28 = arith.mulf %26, %27 : vector<16x32xf32>
    %29 = vector.broadcast %8 : vector<1x32xf32> to vector<16x32xf32>
    %30 = arith.addf %28, %29 : vector<16x32xf32>
    %31 = arith.truncf %30 : vector<16x32xf32> to vector<16x32xbf16>
    %c0_12 = arith.constant 0 : index
    %c0_13 = arith.constant 0 : index
    %32 = vector.load %arg4[%c0_12, %c0_13] : memref<32x96xbf16, #tpu.memory_space<vmem>>, vector<32x96xbf16>
    %cst_14 = arith.constant dense<0.000000e+00> : vector<16x96xf32>
    %33 = tpu.matmul %31, %32, %cst_14 {dimension_numbers = #tpu.dot_dimension_numbers<[1], [0], [0], [1], [0, 0, 1, 1], [], []>} : vector<16x32xbf16>, vector<32x96xbf16>, vector<16x96xf32> -> vector<16x96xf32>
    %c0_15 = arith.constant 0 : index
    %c0_16 = arith.constant 0 : index
    %34 = vector.load %arg5[%c0_15, %c0_16] : memref<1x96xf32, #tpu.memory_space<vmem>>, vector<1x96xf32>
    %35 = vector.broadcast %34 : vector<1x96xf32> to vector<16x96xf32>
    %36 = arith.addf %33, %35 : vector<16x96xf32>
    %37 = vector.extract_strided_slice %36 {offsets = [0, 0], sizes = [16, 32], strides = [1, 1]} : vector<16x96xf32> to vector<16x32xf32>
    %38 = arith.truncf %37 : vector<16x32xf32> to vector<16x32xbf16>
    %39 = vector.shape_cast %38 : vector<16x32xbf16> to vector<2x8x32xbf16>
    %40 = vector.extract_strided_slice %36 {offsets = [0, 32], sizes = [16, 32], strides = [1, 1]} : vector<16x96xf32> to vector<16x32xf32>
    %41 = arith.truncf %40 : vector<16x32xf32> to vector<16x32xbf16>
    %42 = vector.shape_cast %41 : vector<16x32xbf16> to vector<2x8x32xbf16>
    %43 = vector.extract_strided_slice %36 {offsets = [0, 64], sizes = [16, 32], strides = [1, 1]} : vector<16x96xf32> to vector<16x32xf32>
    %44 = arith.truncf %43 : vector<16x32xf32> to vector<16x32xbf16>
    %45 = vector.shape_cast %44 : vector<16x32xbf16> to vector<2x8x32xbf16>
    %46 = vector.extract_strided_slice %39 {offsets = [0, 0, 0], sizes = [2, 8, 8], strides = [1, 1, 1]} : vector<2x8x32xbf16> to vector<2x8x8xbf16>
    %47 = vector.extract_strided_slice %42 {offsets = [0, 0, 0], sizes = [2, 8, 8], strides = [1, 1, 1]} : vector<2x8x32xbf16> to vector<2x8x8xbf16>
    "tpu.trace_start"() <{level = 10 : i32, message = "bqd,bkd->bqk"}> : () -> ()
    %cst_17 = arith.constant dense<0.000000e+00> : vector<2x8x8xf32>
    %48 = tpu.matmul %46, %47, %cst_17 {dimension_numbers = #tpu.dot_dimension_numbers<[2], [2], [1], [1], [0, 0, 0, 1, 1, 1], [0], [0]>} : vector<2x8x8xbf16>, vector<2x8x8xbf16>, vector<2x8x8xf32> -> vector<2x8x8xf32>
    "tpu.trace_stop"() : () -> ()
    %cst_18 = arith.constant dense<0xFF800000> : vector<2x8xf32>
    %49 = vector.multi_reduction <maximumf>, %48, %cst_18 [2] : vector<2x8x8xf32> to vector<2x8xf32>
    %50 = vector.shape_cast %49 : vector<2x8xf32> to vector<2x8x1xf32>
    %51 = vector.broadcast %50 : vector<2x8x1xf32> to vector<2x8x8xf32>
    %52 = arith.subf %48, %51 : vector<2x8x8xf32>
    %53 = math.exp %52 : vector<2x8x8xf32>
    %cst_19 = arith.constant dense<0.000000e+00> : vector<2x8xf32>
    %54 = vector.multi_reduction <add>, %53, %cst_19 [2] : vector<2x8x8xf32> to vector<2x8xf32>
    %55 = vector.shape_cast %54 : vector<2x8xf32> to vector<2x8x1xf32>
    %56 = tpu.reciprocal %55 {approx = true} : vector<2x8x1xf32> -> vector<2x8x1xf32>
    %57 = vector.broadcast %56 : vector<2x8x1xf32> to vector<2x8x8xf32>
    %58 = arith.mulf %53, %57 : vector<2x8x8xf32>
    %59 = arith.truncf %58 : vector<2x8x8xf32> to vector<2x8x8xbf16>
    %60 = vector.extract_strided_slice %45 {offsets = [0, 0, 0], sizes = [2, 8, 8], strides = [1, 1, 1]} : vector<2x8x32xbf16> to vector<2x8x8xbf16>
    "tpu.trace_start"() <{level = 10 : i32, message = "bqk,bkd->bqd"}> : () -> ()
    %cst_20 = arith.constant dense<0.000000e+00> : vector<2x8x8xf32>
    %61 = tpu.matmul %59, %60, %cst_20 {dimension_numbers = #tpu.dot_dimension_numbers<[2], [1], [1], [2], [0, 0, 0, 1, 1, 2], [0], [0]>} : vector<2x8x8xbf16>, vector<2x8x8xbf16>, vector<2x8x8xf32> -> vector<2x8x8xf32>
    "tpu.trace_stop"() : () -> ()
    %62 = vector.extract_strided_slice %39 {offsets = [0, 0, 8], sizes = [2, 8, 8], strides = [1, 1, 1]} : vector<2x8x32xbf16> to vector<2x8x8xbf16>
    %63 = vector.extract_strided_slice %42 {offsets = [0, 0, 8], sizes = [2, 8, 8], strides = [1, 1, 1]} : vector<2x8x32xbf16> to vector<2x8x8xbf16>
    "tpu.trace_start"() <{level = 10 : i32, message = "bqd,bkd->bqk"}> : () -> ()
    %cst_21 = arith.constant dense<0.000000e+00> : vector<2x8x8xf32>
    %64 = tpu.matmul %62, %63, %cst_21 {dimension_numbers = #tpu.dot_dimension_numbers<[2], [2], [1], [1], [0, 0, 0, 1, 1, 1], [0], [0]>} : vector<2x8x8xbf16>, vector<2x8x8xbf16>, vector<2x8x8xf32> -> vector<2x8x8xf32>
    "tpu.trace_stop"() : () -> ()
    %cst_22 = arith.constant dense<0xFF800000> : vector<2x8xf32>
    %65 = vector.multi_reduction <maximumf>, %64, %cst_22 [2] : vector<2x8x8xf32> to vector<2x8xf32>
    %66 = vector.shape_cast %65 : vector<2x8xf32> to vector<2x8x1xf32>
    %67 = vector.broadcast %66 : vector<2x8x1xf32> to vector<2x8x8xf32>
    %68 = arith.subf %64, %67 : vector<2x8x8xf32>
    %69 = math.exp %68 : vector<2x8x8xf32>
    %cst_23 = arith.constant dense<0.000000e+00> : vector<2x8xf32>
    %70 = vector.multi_reduction <add>, %69, %cst_23 [2] : vector<2x8x8xf32> to vector<2x8xf32>
    %71 = vector.shape_cast %70 : vector<2x8xf32> to vector<2x8x1xf32>
    %72 = tpu.reciprocal %71 {approx = true} : vector<2x8x1xf32> -> vector<2x8x1xf32>
    %73 = vector.broadcast %72 : vector<2x8x1xf32> to vector<2x8x8xf32>
    %74 = arith.mulf %69, %73 : vector<2x8x8xf32>
    %75 = arith.truncf %74 : vector<2x8x8xf32> to vector<2x8x8xbf16>
    %76 = vector.extract_strided_slice %45 {offsets = [0, 0, 8], sizes = [2, 8, 8], strides = [1, 1, 1]} : vector<2x8x32xbf16> to vector<2x8x8xbf16>
    "tpu.trace_start"() <{level = 10 : i32, message = "bqk,bkd->bqd"}> : () -> ()
    %cst_24 = arith.constant dense<0.000000e+00> : vector<2x8x8xf32>
    %77 = tpu.matmul %75, %76, %cst_24 {dimension_numbers = #tpu.dot_dimension_numbers<[2], [1], [1], [2], [0, 0, 0, 1, 1, 2], [0], [0]>} : vector<2x8x8xbf16>, vector<2x8x8xbf16>, vector<2x8x8xf32> -> vector<2x8x8xf32>
    "tpu.trace_stop"() : () -> ()
    %78 = vector.extract_strided_slice %39 {offsets = [0, 0, 16], sizes = [2, 8, 8], strides = [1, 1, 1]} : vector<2x8x32xbf16> to vector<2x8x8xbf16>
    %79 = vector.extract_strided_slice %42 {offsets = [0, 0, 16], sizes = [2, 8, 8], strides = [1, 1, 1]} : vector<2x8x32xbf16> to vector<2x8x8xbf16>
    "tpu.trace_start"() <{level = 10 : i32, message = "bqd,bkd->bqk"}> : () -> ()
    %cst_25 = arith.constant dense<0.000000e+00> : vector<2x8x8xf32>
    %80 = tpu.matmul %78, %79, %cst_25 {dimension_numbers = #tpu.dot_dimension_numbers<[2], [2], [1], [1], [0, 0, 0, 1, 1, 1], [0], [0]>} : vector<2x8x8xbf16>, vector<2x8x8xbf16>, vector<2x8x8xf32> -> vector<2x8x8xf32>
    "tpu.trace_stop"() : () -> ()
    %cst_26 = arith.constant dense<0xFF800000> : vector<2x8xf32>
    %81 = vector.multi_reduction <maximumf>, %80, %cst_26 [2] : vector<2x8x8xf32> to vector<2x8xf32>
    %82 = vector.shape_cast %81 : vector<2x8xf32> to vector<2x8x1xf32>
    %83 = vector.broadcast %82 : vector<2x8x1xf32> to vector<2x8x8xf32>
    %84 = arith.subf %80, %83 : vector<2x8x8xf32>
    %85 = math.exp %84 : vector<2x8x8xf32>
    %cst_27 = arith.constant dense<0.000000e+00> : vector<2x8xf32>
    %86 = vector.multi_reduction <add>, %85, %cst_27 [2] : vector<2x8x8xf32> to vector<2x8xf32>
    %87 = vector.shape_cast %86 : vector<2x8xf32> to vector<2x8x1xf32>
    %88 = tpu.reciprocal %87 {approx = true} : vector<2x8x1xf32> -> vector<2x8x1xf32>
    %89 = vector.broadcast %88 : vector<2x8x1xf32> to vector<2x8x8xf32>
    %90 = arith.mulf %85, %89 : vector<2x8x8xf32>
    %91 = arith.truncf %90 : vector<2x8x8xf32> to vector<2x8x8xbf16>
    %92 = vector.extract_strided_slice %45 {offsets = [0, 0, 16], sizes = [2, 8, 8], strides = [1, 1, 1]} : vector<2x8x32xbf16> to vector<2x8x8xbf16>
    "tpu.trace_start"() <{level = 10 : i32, message = "bqk,bkd->bqd"}> : () -> ()
    %cst_28 = arith.constant dense<0.000000e+00> : vector<2x8x8xf32>
    %93 = tpu.matmul %91, %92, %cst_28 {dimension_numbers = #tpu.dot_dimension_numbers<[2], [1], [1], [2], [0, 0, 0, 1, 1, 2], [0], [0]>} : vector<2x8x8xbf16>, vector<2x8x8xbf16>, vector<2x8x8xf32> -> vector<2x8x8xf32>
    "tpu.trace_stop"() : () -> ()
    %94 = vector.extract_strided_slice %39 {offsets = [0, 0, 24], sizes = [2, 8, 8], strides = [1, 1, 1]} : vector<2x8x32xbf16> to vector<2x8x8xbf16>
    %95 = vector.extract_strided_slice %42 {offsets = [0, 0, 24], sizes = [2, 8, 8], strides = [1, 1, 1]} : vector<2x8x32xbf16> to vector<2x8x8xbf16>
    "tpu.trace_start"() <{level = 10 : i32, message = "bqd,bkd->bqk"}> : () -> ()
    %cst_29 = arith.constant dense<0.000000e+00> : vector<2x8x8xf32>
    %96 = tpu.matmul %94, %95, %cst_29 {dimension_numbers = #tpu.dot_dimension_numbers<[2], [2], [1], [1], [0, 0, 0, 1, 1, 1], [0], [0]>} : vector<2x8x8xbf16>, vector<2x8x8xbf16>, vector<2x8x8xf32> -> vector<2x8x8xf32>
    "tpu.trace_stop"() : () -> ()
    %cst_30 = arith.constant dense<0xFF800000> : vector<2x8xf32>
    %97 = vector.multi_reduction <maximumf>, %96, %cst_30 [2] : vector<2x8x8xf32> to vector<2x8xf32>
    %98 = vector.shape_cast %97 : vector<2x8xf32> to vector<2x8x1xf32>
    %99 = vector.broadcast %98 : vector<2x8x1xf32> to vector<2x8x8xf32>
    %100 = arith.subf %96, %99 : vector<2x8x8xf32>
    %101 = math.exp %100 : vector<2x8x8xf32>
    %cst_31 = arith.constant dense<0.000000e+00> : vector<2x8xf32>
    %102 = vector.multi_reduction <add>, %101, %cst_31 [2] : vector<2x8x8xf32> to vector<2x8xf32>
    %103 = vector.shape_cast %102 : vector<2x8xf32> to vector<2x8x1xf32>
    %104 = tpu.reciprocal %103 {approx = true} : vector<2x8x1xf32> -> vector<2x8x1xf32>
    %105 = vector.broadcast %104 : vector<2x8x1xf32> to vector<2x8x8xf32>
    %106 = arith.mulf %101, %105 : vector<2x8x8xf32>
    %107 = arith.truncf %106 : vector<2x8x8xf32> to vector<2x8x8xbf16>
    %108 = vector.extract_strided_slice %45 {offsets = [0, 0, 24], sizes = [2, 8, 8], strides = [1, 1, 1]} : vector<2x8x32xbf16> to vector<2x8x8xbf16>
    "tpu.trace_start"() <{level = 10 : i32, message = "bqk,bkd->bqd"}> : () -> ()
    %cst_32 = arith.constant dense<0.000000e+00> : vector<2x8x8xf32>
    %109 = tpu.matmul %107, %108, %cst_32 {dimension_numbers = #tpu.dot_dimension_numbers<[2], [1], [1], [2], [0, 0, 0, 1, 1, 2], [0], [0]>} : vector<2x8x8xbf16>, vector<2x8x8xbf16>, vector<2x8x8xf32> -> vector<2x8x8xf32>
    "tpu.trace_stop"() : () -> ()
    %110 = tpu.concatenate %61, %77, %93, %109 in 2 : vector<2x8x8xf32>, vector<2x8x8xf32>, vector<2x8x8xf32>, vector<2x8x8xf32> -> vector<2x8x32xf32>
    %111 = vector.shape_cast %110 : vector<2x8x32xf32> to vector<16x32xf32>
    %112 = arith.truncf %111 : vector<16x32xf32> to vector<16x32xbf16>
    %c0_33 = arith.constant 0 : index
    %c0_34 = arith.constant 0 : index
    %113 = vector.load %arg6[%c0_33, %c0_34] : memref<32x32xbf16, #tpu.memory_space<vmem>>, vector<32x32xbf16>
    %cst_35 = arith.constant dense<0.000000e+00> : vector<16x32xf32>
    %114 = tpu.matmul %112, %113, %cst_35 {dimension_numbers = #tpu.dot_dimension_numbers<[1], [0], [0], [1], [0, 0, 1, 1], [], []>} : vector<16x32xbf16>, vector<32x32xbf16>, vector<16x32xf32> -> vector<16x32xf32>
    %c0_36 = arith.constant 0 : index
    %c0_37 = arith.constant 0 : index
    %115 = vector.load %arg7[%c0_36, %c0_37] : memref<1x32xf32, #tpu.memory_space<vmem>>, vector<1x32xf32>
    %116 = vector.broadcast %115 : vector<1x32xf32> to vector<16x32xf32>
    %117 = arith.addf %114, %116 : vector<16x32xf32>
    %118 = arith.addf %117, %6 : vector<16x32xf32>
    %c0_38 = arith.constant 0 : index
    %c0_39 = arith.constant 0 : index
    %119 = vector.load %arg8[%c0_38, %c0_39] : memref<1x32xf32, #tpu.memory_space<vmem>>, vector<1x32xf32>
    %c0_40 = arith.constant 0 : index
    %c0_41 = arith.constant 0 : index
    %120 = vector.load %arg9[%c0_40, %c0_41] : memref<1x32xf32, #tpu.memory_space<vmem>>, vector<1x32xf32>
    %cst_42 = arith.constant dense<0.000000e+00> : vector<16xf32>
    %121 = vector.multi_reduction <add>, %118, %cst_42 [1] : vector<16x32xf32> to vector<16xf32>
    %122 = vector.shape_cast %121 : vector<16xf32> to vector<16x1xf32>
    %cst_43 = arith.constant 3.200000e+01 : f32
    %123 = vector.broadcast %cst_43 : f32 to vector<16x1xf32>
    %124 = arith.divf %122, %123 : vector<16x1xf32>
    %125 = vector.broadcast %124 : vector<16x1xf32> to vector<16x32xf32>
    %126 = arith.subf %118, %125 : vector<16x32xf32>
    %127 = arith.mulf %126, %126 : vector<16x32xf32>
    %cst_44 = arith.constant dense<0.000000e+00> : vector<16xf32>
    %128 = vector.multi_reduction <add>, %127, %cst_44 [1] : vector<16x32xf32> to vector<16xf32>
    %129 = vector.shape_cast %128 : vector<16xf32> to vector<16x1xf32>
    %cst_45 = arith.constant 3.200000e+01 : f32
    %130 = vector.broadcast %cst_45 : f32 to vector<16x1xf32>
    %131 = arith.divf %129, %130 : vector<16x1xf32>
    %132 = vector.broadcast %124 : vector<16x1xf32> to vector<16x32xf32>
    %133 = arith.subf %118, %132 : vector<16x32xf32>
    %cst_46 = arith.constant 9.99999974E-6 : f32
    %134 = vector.broadcast %cst_46 : f32 to vector<16x1xf32>
    %135 = arith.addf %131, %134 : vector<16x1xf32>
    %136 = math.rsqrt %135 : vector<16x1xf32>
    %137 = vector.broadcast %136 : vector<16x1xf32> to vector<16x32xf32>
    %138 = arith.mulf %133, %137 : vector<16x32xf32>
    %139 = vector.broadcast %119 : vector<1x32xf32> to vector<16x32xf32>
    %140 = arith.mulf %138, %139 : vector<16x32xf32>
    %141 = vector.broadcast %120 : vector<1x32xf32> to vector<16x32xf32>
    %142 = arith.addf %140, %141 : vector<16x32xf32>
    %143 = arith.truncf %142 : vector<16x32xf32> to vector<16x32xbf16>
    %c0_47 = arith.constant 0 : index
    %c0_48 = arith.constant 0 : index
    %144 = vector.load %arg10[%c0_47, %c0_48] : memref<32x64xbf16, #tpu.memory_space<vmem>>, vector<32x64xbf16>
    %cst_49 = arith.constant dense<0.000000e+00> : vector<16x64xf32>
    %145 = tpu.matmul %143, %144, %cst_49 {dimension_numbers = #tpu.dot_dimension_numbers<[1], [0], [0], [1], [0, 0, 1, 1], [], []>} : vector<16x32xbf16>, vector<32x64xbf16>, vector<16x64xf32> -> vector<16x64xf32>
    %c0_50 = arith.constant 0 : index
    %c0_51 = arith.constant 0 : index
    %146 = vector.load %arg11[%c0_50, %c0_51] : memref<1x64xf32, #tpu.memory_space<vmem>>, vector<1x64xf32>
    %147 = vector.broadcast %146 : vector<1x64xf32> to vector<16x64xf32>
    %148 = arith.addf %145, %147 : vector<16x64xf32>
    %cst_52 = arith.constant 5.000000e-01 : f32
    %149 = vector.broadcast %cst_52 : f32 to vector<16x64xf32>
    %150 = arith.mulf %149, %148 : vector<16x64xf32>
    %cst_53 = arith.constant 0.707106769 : f32
    %151 = vector.broadcast %cst_53 : f32 to vector<16x64xf32>
    %152 = arith.mulf %148, %151 : vector<16x64xf32>
    %153 = math.erf %152 : vector<16x64xf32>
    %cst_54 = arith.constant 1.000000e+00 : f32
    %154 = vector.broadcast %cst_54 : f32 to vector<16x64xf32>
    %155 = arith.addf %154, %153 : vector<16x64xf32>
    %156 = arith.mulf %150, %155 : vector<16x64xf32>
    %157 = arith.truncf %156 : vector<16x64xf32> to vector<16x64xbf16>
    %c0_55 = arith.constant 0 : index
    %c0_56 = arith.constant 0 : index
    %158 = vector.load %arg12[%c0_55, %c0_56] : memref<64x32xbf16, #tpu.memory_space<vmem>>, vector<64x32xbf16>
    %cst_57 = arith.constant dense<0.000000e+00> : vector<16x32xf32>
    %159 = tpu.matmul %157, %158, %cst_57 {dimension_numbers = #tpu.dot_dimension_numbers<[1], [0], [0], [1], [0, 0, 1, 1], [], []>} : vector<16x64xbf16>, vector<64x32xbf16>, vector<16x32xf32> -> vector<16x32xf32>
    %c0_58 = arith.constant 0 : index
    %c0_59 = arith.constant 0 : index
    %160 = vector.load %arg13[%c0_58, %c0_59] : memref<1x32xf32, #tpu.memory_space<vmem>>, vector<1x32xf32>
    %161 = vector.broadcast %160 : vector<1x32xf32> to vector<16x32xf32>
    %162 = arith.addf %159, %161 : vector<16x32xf32>
    %cst_60 = arith.constant 5.000000e-01 : f32
    %163 = vector.broadcast %cst_60 : f32 to vector<16x32xf32>
    %164 = arith.mulf %163, %162 : vector<16x32xf32>
    %cst_61 = arith.constant 0.707106769 : f32
    %165 = vector.broadcast %cst_61 : f32 to vector<16x32xf32>
    %166 = arith.mulf %162, %165 : vector<16x32xf32>
    %167 = math.erf %166 : vector<16x32xf32>
    %cst_62 = arith.constant 1.000000e+00 : f32
    %168 = vector.broadcast %cst_62 : f32 to vector<16x32xf32>
    %169 = arith.addf %168, %167 : vector<16x32xf32>
    %170 = arith.mulf %164, %169 : vector<16x32xf32>
    %171 = arith.addf %170, %118 : vector<16x32xf32>
    %172 = vector.extract_strided_slice %171 {offsets = [0, 0], sizes = [8, 32], strides = [1, 1]} : vector<16x32xf32> to vector<8x32xf32>
    %173 = tpu.transpose %172, [1, 0] : vector<8x32xf32> -> vector<32x8xf32>
    %c0_63 = arith.constant 0 : index
    %c0_64 = arith.constant 0 : index
    %c0_65 = arith.constant 0 : index
    %174 = vector.load %arg14[%c0_63, %c0_64, %c0_65] : memref<2x32x8xf32, #tpu.memory_space<vmem>>, vector<1x32x8xf32>
    %175 = vector.shape_cast %174 : vector<1x32x8xf32> to vector<32x8xf32>
    %176 = vector.shape_cast %173 : vector<32x8xf32> to vector<1x32x8xf32>
    tpu.vector_store %arg14[%c0_63, %c0_64, %c0_65], %176 {strides = array<i32>} : memref<2x32x8xf32, #tpu.memory_space<vmem>>, vector<1x32x8xf32>,
    %177 = vector.extract_strided_slice %171 {offsets = [8, 0], sizes = [8, 32], strides = [1, 1]} : vector<16x32xf32> to vector<8x32xf32>
    %178 = tpu.transpose %177, [1, 0] : vector<8x32xf32> -> vector<32x8xf32>
    %c1_66 = arith.constant 1 : index
    %c0_67 = arith.constant 0 : index
    %c0_68 = arith.constant 0 : index
    %179 = vector.load %arg14[%c1_66, %c0_67, %c0_68] : memref<2x32x8xf32, #tpu.memory_space<vmem>>, vector<1x32x8xf32>
    %180 = vector.shape_cast %179 : vector<1x32x8xf32> to vector<32x8xf32>
    %181 = vector.shape_cast %178 : vector<32x8xf32> to vector<1x32x8xf32>
    tpu.vector_store %arg14[%c1_66, %c0_67, %c0_68], %181 {strides = array<i32>} : memref<2x32x8xf32, #tpu.memory_space<vmem>>, vector<1x32x8xf32>,
    return
  }
  func.func @transform_0(%arg0: i32) -> (i32, i32, i32) {
    %c0_i32 = arith.constant 0 : i32
    %c0_i32_0 = arith.constant 0 : i32
    %c0_i32_1 = arith.constant 0 : i32
    return %arg0, %c0_i32, %c0_i32_0 : i32, i32, i32
  }
  func.func @transform_1(%arg0: i32) -> (i32, i32) {
    %c0_i32 = arith.constant 0 : i32
    %c0_i32_0 = arith.constant 0 : i32
    %c0_i32_1 = arith.constant 0 : i32
    return %c0_i32, %c0_i32_0 : i32, i32
  }
  func.func @transform_2(%arg0: i32) -> (i32, i32) {
    %c0_i32 = arith.constant 0 : i32
    %c0_i32_0 = arith.constant 0 : i32
    %c0_i32_1 = arith.constant 0 : i32
    return %c0_i32, %c0_i32_0 : i32, i32
  }
  func.func @transform_3(%arg0: i32) -> (i32, i32) {
    %c0_i32 = arith.constant 0 : i32
    %c0_i32_0 = arith.constant 0 : i32
    %c0_i32_1 = arith.constant 0 : i32
    return %c0_i32, %c0_i32_0 : i32, i32
  }
  func.func @transform_4(%arg0: i32) -> (i32, i32) {
    %c0_i32 = arith.constant 0 : i32
    %c0_i32_0 = arith.constant 0 : i32
    %c0_i32_1 = arith.constant 0 : i32
    return %c0_i32, %c0_i32_0 : i32, i32
  }
  func.func @transform_5(%arg0: i32) -> (i32, i32) {
    %c0_i32 = arith.constant 0 : i32
    %c0_i32_0 = arith.constant 0 : i32
    %c0_i32_1 = arith.constant 0 : i32
    return %c0_i32, %c0_i32_0 : i32, i32
  }
  func.func @transform_6(%arg0: i32) -> (i32, i32) {
    %c0_i32 = arith.constant 0 : i32
    %c0_i32_0 = arith.constant 0 : i32
    %c0_i32_1 = arith.constant 0 : i32
    return %c0_i32, %c0_i32_0 : i32, i32
  }
  func.func @transform_7(%arg0: i32) -> (i32, i32) {
    %c0_i32 = arith.constant 0 : i32
    %c0_i32_0 = arith.constant 0 : i32
    %c0_i32_1 = arith.constant 0 : i32
    return %c0_i32, %c0_i32_0 : i32, i32
  }
  func.func @transform_8(%arg0: i32) -> (i32, i32) {
    %c0_i32 = arith.constant 0 : i32
    %c0_i32_0 = arith.constant 0 : i32
    %c0_i32_1 = arith.constant 0 : i32
    return %c0_i32, %c0_i32_0 : i32, i32
  }
  func.func @transform_9(%arg0: i32) -> (i32, i32) {
    %c0_i32 = arith.constant 0 : i32
    %c0_i32_0 = arith.constant 0 : i32
    %c0_i32_1 = arith.constant 0 : i32
    return %c0_i32, %c0_i32_0 : i32, i32
  }
  func.func @transform_10(%arg0: i32) -> (i32, i32) {
    %c0_i32 = arith.constant 0 : i32
    %c0_i32_0 = arith.constant 0 : i32
    %c0_i32_1 = arith.constant 0 : i32
    return %c0_i32, %c0_i32_0 : i32, i32
  }
  func.func @transform_11(%arg0: i32) -> (i32, i32) {
    %c0_i32 = arith.constant 0 : i32
    %c0_i32_0 = arith.constant 0 : i32
    %c0_i32_1 = arith.constant 0 : i32
    return %c0_i32, %c0_i32_0 : i32, i32
  }
  func.func @transform_12(%arg0: i32) -> (i32, i32) {
    %c0_i32 = arith.constant 0 : i32
    %c0_i32_0 = arith.constant 0 : i32
    %c0_i32_1 = arith.constant 0 : i32
    return %c0_i32, %c0_i32_0 : i32, i32
  }
  func.func @transform_13(%arg0: i32) -> (i32, i32, i32) {
    %c0_i32 = arith.constant 0 : i32
    %c0_i32_0 = arith.constant 0 : i32
    %c0_i32_1 = arith.constant 0 : i32
    return %arg0, %c0_i32, %c0_i32_0 : i32, i32, i32
  }
}

</mosaic_0001>

<bundles_post_ra>
// kernel: tpu_custom_call.1
= control target key start
LH: loop header
LB: loop body
LE: loop exit
PB: predicated region body
PF: predicated region fallthrough
CT: control target
= control target key end

     0   :  { %18 = vsyncpa [#allocation3], 0  ;;  %s2846_s0 = inlined_call_operand.hbm [shape: f32[2,32,8], index: 0, kind: input, shape index: {}]   ;;  %s2847_s1 = inlined_call_operand.hbm [shape: f32[1,32], index: 1, kind: input, shape index: {}]   ;;  %s2848_s2 = inlined_call_operand.hbm [shape: f32[1,32], index: 2, kind: input, shape index: {}]   ;;  %s2849_s3 = inlined_call_operand.hbm [shape: bf16[32,96], index: 3, kind: input, shape index: {}]   ;;  %s2850_s4 = inlined_call_operand.hbm [shape: f32[1,96], index: 4, kind: input, shape index: {}]   ;;  %s2851_s5 = inlined_call_operand.hbm [shape: bf16[32,32], index: 5, kind: input, shape index: {}]   ;;  %s2852_s6 = inlined_call_operand.hbm [shape: f32[1,32], index: 6, kind: input, shape index: {}]   ;;  %s2853_s7 = inlined_call_operand.hbm [shape: f32[1,32], index: 7, kind: input, shape index: {}]   ;;  %s2854_s8 = inlined_call_operand.hbm [shape: f32[1,32], index: 8, kind: input, shape index: {}]   ;;  %s2855_s9 = inlined_call_operand.hbm [shape: bf16[32,64], index: 9, kind: input, shape index: {}]   ;;  %s2856_s10 = inlined_call_operand.hbm [shape: f32[1,64], index: 10, kind: input, shape index: {}]   ;;  %s2857_s11 = inlined_call_operand.hbm [shape: bf16[64,32], index: 11, kind: input, shape index: {}]   ;;  %s2858_s12 = inlined_call_operand.hbm [shape: f32[1,32], index: 12, kind: input, shape index: {}]   ;;  %s2859_s13 = inlined_call_operand.hbm [shape: f32[2,32,8], index: 13, kind: output, shape index: {}]  }
   0x1   :  { %19 = vsyncpa [#allocation6], 0 }
   0x2   :  { %20 = vsyncpa [#allocation9], 0 }
   0x3   :  { %21 = vsyncpa [#allocation12], 0 }
   0x4   :  { %22 = vsyncpa [#allocation15], 0 }
   0x5   :  { %23 = vsyncpa [#allocation18], 0 }
   0x6   :  { %24 = vsyncpa [#allocation21], 0 }
   0x7   :  { %25 = vsyncpa [#allocation4], 0  ;;  %s2343_s25 = smov [#allocation5]   ;;  %s2344_s27 = smov [#allocation8]  }
   0x8   :  { %s44_s26 = sshll.u32 %s2343_s25, 4  ;;  %s63_s28 = sshll.u32 %s2344_s27, 4  ;;  %s45_s26 = int_to_ptr.vmem [resolvable:$true] %s44_s26  ;;  %s2445_s28 = int_to_ptr.vmem [resolvable:$true] %s63_s28 }
   0x9   :  { %s2019_s14 = scalar_lea.hbm %s2847_s1, 16 }
   0xa   :  { %p2020_p0 = scmp.ne.s32.totalorder %s2847_s1, %s2019_s14  ;;  %p2023_p1 = scmp.lt.u32.totalorder %s2019_s14, %s2847_s1 }
   0xc   :  { %p2025_p2 = pnand %p2023_p1, %p2020_p0 }
   0xe   :  { %2028 = shalt.err (!%p2025_p2)
}
   0xf   :  { %s2029_s19 = scalar_lea.vmem %s45_s26, 16  ;;  %s2033_s20 = scalar_lea.vmem %s45_s26, 32 }
  0x10   :  { %p2030_p3 = scmp.ne.s32.totalorder %s45_s26, %s2029_s19  ;;  %p2034_p4 = scmp.lt.s32.totalorder %s45_s26, %s45_s26 }
  0x11   :  { %p2035_p5 = scmp.lt.s32.totalorder %s2033_s20, %s2029_s19 }
  0x13   :  { %p2036_p6 = por %p2035_p5, %p2034_p4 }
  0x15   :  { %p2037_p7 = pnand %p2036_p6, %p2030_p3 }
  0x17   :  { %2040 = shalt.err (!%p2037_p7)
}
  0x18   :  { %47 = dma.hbm_to_vmem [thread:$0]  %s2847_s1, 16, %s45_s26, [#allocation6]  }
  0x19   :  { %s2041_s25 = scalar_lea.hbm %s2849_s3, 256 }
  0x1a   :  { %p2042_p8 = scmp.ne.s32.totalorder %s2849_s3, %s2041_s25  ;;  %p2045_p9 = scmp.lt.u32.totalorder %s2041_s25, %s2849_s3 }
  0x1c   :  { %p2047_p10 = pnand %p2045_p9, %p2042_p8 }
  0x1e   :  { %2050 = shalt.err (!%p2047_p10)
}
  0x1f   :  { %s2051_s15 = scalar_lea.vmem %s2445_s28, 256  ;;  %p2056_p12 = scmp.lt.s32.totalorder %s2445_s28, %s2445_s28 }
  0x20   :  { %p2052_p11 = scmp.ne.s32.totalorder %s2445_s28, %s2051_s15  ;;  %p2057_p13 = scmp.lt.s32.totalorder %s2051_s15, %s2051_s15 }
  0x22   :  { %p2058_p0 = por %p2057_p13, %p2056_p12 }
  0x24   :  { %p2059_p1 = pnand %p2058_p0, %p2052_p11 }
  0x26   :  { %2062 = shalt.err (!%p2059_p1)
}
  0x27   :  { %s2345_s1 = smov 64   ;;  %s2346_s26 = smov 4  }
  0x28   :  { %69 = dma.hbm_to_vmem [thread:$0]  %s2849_s3, 256, %s2445_s28, [#allocation9], %s2345_s1, %s2345_s1, %s2346_s26  }
  0x29   :  { %s2347_s18 = smov [#allocation11]   ;;  %s2348_s20 = smov [#allocation14]  }
  0x2a   :  { %s85_s19 = sshll.u32 %s2347_s18, 4  ;;  %s108_s21 = sshll.u32 %s2348_s20, 4  ;;  %s86_s19 = int_to_ptr.vmem [resolvable:$true] %s85_s19  ;;  %s109_s21 = int_to_ptr.vmem [resolvable:$true] %s108_s21 }
  0x2b   :  { %s2063_s24 = scalar_lea.hbm %s2851_s5, 256 }
  0x2c   :  { %p2064_p2 = scmp.ne.s32.totalorder %s2851_s5, %s2063_s24  ;;  %p2067_p3 = scmp.lt.u32.totalorder %s2063_s24, %s2851_s5 }
  0x2e   :  { %p2069_p4 = pnand %p2067_p3, %p2064_p2 }
  0x30   :  { %2072 = shalt.err (!%p2069_p4)
}
  0x31   :  { %s2073_s3 = scalar_lea.vmem %s86_s19, 256  ;;  %p2078_p6 = scmp.lt.s32.totalorder %s86_s19, %s86_s19 }
  0x32   :  { %p2074_p5 = scmp.ne.s32.totalorder %s86_s19, %s2073_s3  ;;  %p2079_p7 = scmp.lt.s32.totalorder %s2073_s3, %s2073_s3 }
  0x34   :  { %p2080_p8 = por %p2079_p7, %p2078_p6 }
  0x36   :  { %p2081_p9 = pnand %p2080_p8, %p2074_p5 }
  0x38   :  { %2084 = shalt.err (!%p2081_p9)
}
  0x39   :  { %91 = dma.hbm_to_vmem [thread:$0]  %s2851_s5, 256, %s86_s19, [#allocation12], %s2345_s1, %s2345_s1, %s2346_s26  }
  0x3a   :  { %s2085_s17 = scalar_lea.hbm %s2853_s7, 16 }
  0x3b   :  { %p2086_p10 = scmp.ne.s32.totalorder %s2853_s7, %s2085_s17  ;;  %p2089_p11 = scmp.lt.u32.totalorder %s2085_s17, %s2853_s7 }
  0x3d   :  { %p2091_p12 = pnand %p2089_p11, %p2086_p10 }
  0x3f   :  { %2094 = shalt.err (!%p2091_p12)
}
  0x40   :  { %s2095_s24 = scalar_lea.vmem %s109_s21, 16  ;;  %s2099_s25 = scalar_lea.vmem %s109_s21, 32 }
  0x41   :  { %p2096_p13 = scmp.ne.s32.totalorder %s109_s21, %s2095_s24  ;;  %p2100_p0 = scmp.lt.s32.totalorder %s109_s21, %s109_s21 }
  0x42   :  { %p2101_p1 = scmp.lt.s32.totalorder %s2099_s25, %s2095_s24 }
  0x44   :  { %p2102_p2 = por %p2101_p1, %p2100_p0 }
  0x46   :  { %p2103_p3 = pnand %p2102_p2, %p2096_p13 }
  0x48   :  { %2106 = shalt.err (!%p2103_p3)
}
  0x49   :  { %111 = dma.hbm_to_vmem [thread:$0]  %s2853_s7, 16, %s109_s21, [#allocation15]  }
  0x4a   :  { %s2349_s27 = smov [#allocation17]   ;;  %s2350_s30 = smov [#allocation20]  }
  0x4b   :  { %s127_s29 = sshll.u32 %s2349_s27, 4  ;;  %s149_s3 = sshll.u32 %s2350_s30, 4  ;;  %s128_s29 = int_to_ptr.vmem [resolvable:$true] %s127_s29  ;;  %s2506_s3 = int_to_ptr.vmem [resolvable:$true] %s149_s3 }
  0x4c   :  { %s2107_s15 = scalar_lea.hbm %s2855_s9, 256 }
  0x4d   :  { %p2108_p4 = scmp.ne.s32.totalorder %s2855_s9, %s2107_s15  ;;  %p2111_p5 = scmp.lt.u32.totalorder %s2107_s15, %s2855_s9 }
  0x4f   :  { %p2113_p6 = pnand %p2111_p5, %p2108_p4 }
  0x51   :  { %2116 = shalt.err (!%p2113_p6)
}
  0x52   :  { %s2117_s7 = scalar_lea.vmem %s128_s29, 256  ;;  %p2122_p8 = scmp.lt.s32.totalorder %s128_s29, %s128_s29 }
  0x53   :  { %p2118_p7 = scmp.ne.s32.totalorder %s128_s29, %s2117_s7  ;;  %p2123_p9 = scmp.lt.s32.totalorder %s2117_s7, %s2117_s7 }
  0x55   :  { %p2124_p10 = por %p2123_p9, %p2122_p8 }
  0x57   :  { %p2125_p11 = pnand %p2124_p10, %p2118_p7 }
  0x59   :  { %2128 = shalt.err (!%p2125_p11)
}
  0x5a   :  { %133 = dma.hbm_to_vmem [thread:$0]  %s2855_s9, 256, %s128_s29, [#allocation18], %s2345_s1, %s2345_s1, %s2346_s26  }
  0x5b   :  { %s2129_s25 = scalar_lea.hbm %s2857_s11, 512 }
  0x5c   :  { %p2130_p12 = scmp.ne.s32.totalorder %s2857_s11, %s2129_s25  ;;  %p2133_p13 = scmp.lt.u32.totalorder %s2129_s25, %s2857_s11 }
  0x5e   :  { %p2135_p0 = pnand %p2133_p13, %p2130_p12 }
  0x60   :  { %2138 = shalt.err (!%p2135_p0)
}
  0x61   :  { %s2139_s28 = scalar_lea.vmem %s2506_s3, 512  ;;  %p2144_p2 = scmp.lt.s32.totalorder %s2506_s3, %s2506_s3 }
  0x62   :  { %p2140_p1 = scmp.ne.s32.totalorder %s2506_s3, %s2139_s28  ;;  %p2145_p3 = scmp.lt.s32.totalorder %s2139_s28, %s2139_s28 }
  0x64   :  { %p2146_p4 = por %p2145_p3, %p2144_p2 }
  0x66   :  { %p2147_p5 = pnand %p2146_p4, %p2140_p1 }
  0x68   :  { %2150 = shalt.err (!%p2147_p5)
}
  0x69   :  { %155 = dma.hbm_to_vmem [thread:$0]  %s2857_s11, 512, %s2506_s3, [#allocation21], %s2345_s1, %s2345_s1, %s2346_s26  }
  0x6a   :  { %s2351_s14 = smov [#allocation2]   ;;  %s2151_s18 = scalar_lea.hbm %s2846_s0, 1024 }
  0x6b   :  { %s31_s15 = sshll.u32 %s2351_s14, 4  ;;  %p2152_p6 = scmp.ne.s32.totalorder %s2846_s0, %s2151_s18  ;;  %s32_s15 = int_to_ptr.vmem [resolvable:$true] %s31_s15 }
  0x6c   :  { %p2155_p7 = scmp.lt.u32.totalorder %s2151_s18, %s2846_s0 }
  0x6e   :  { %p2157_p8 = pnand %p2155_p7, %p2152_p6 }
  0x70   :  { %2160 = shalt.err (!%p2157_p8)
}
  0x71   :  { %s2161_s23 = scalar_lea.vmem %s32_s15, 1024  ;;  %p2166_p10 = scmp.lt.s32.totalorder %s32_s15, %s32_s15 }
  0x72   :  { %p2162_p9 = scmp.ne.s32.totalorder %s32_s15, %s2161_s23  ;;  %p2167_p11 = scmp.lt.s32.totalorder %s2161_s23, %s2161_s23 }
  0x74   :  { %p2168_p12 = por %p2167_p11, %p2166_p10 }
  0x76   :  { %p2169_p13 = pnand %p2168_p12, %p2162_p9 }
  0x78   :  { %2172 = shalt.err (!%p2169_p13)
}
  0x79   :  { %s2352_s11 = smov 128   ;;  %s2353_s26 = smov 8  }
  0x7a   :  { %37 = dma.hbm_to_vmem [thread:$0]  %s2846_s0, 1024, %s32_s15, [#allocation3], %s2352_s11, %s2352_s11, %s2353_s26  }
  0x7b   :  { %s2354_s25 = smov [#allocation7]   ;;  %s2355_s19 = smov [#allocation10]  }
  0x7c   :  { %s54_s5 = sshll.u32 %s2354_s25, 4  ;;  %s76_s27 = sshll.u32 %s2355_s19, 4  ;;  %s55_s5 = int_to_ptr.vmem [resolvable:$true] %s54_s5  ;;  %s77_s27 = int_to_ptr.vmem [resolvable:$true] %s76_s27 }
  0x7d   :  { %s2173_s9 = scalar_lea.hbm %s2848_s2, 16 }
  0x7e   :  { %p2174_p0 = scmp.ne.s32.totalorder %s2848_s2, %s2173_s9  ;;  %p2177_p1 = scmp.lt.u32.totalorder %s2173_s9, %s2848_s2 }
  0x80   :  { %p2179_p2 = pnand %p2177_p1, %p2174_p0 }
  0x82   :  { %2182 = shalt.err (!%p2179_p2)
}
  0x83   :  { %s2183_s0 = scalar_lea.vmem %s55_s5, 16  ;;  %s2187_s15 = scalar_lea.vmem %s55_s5, 32 }
  0x84   :  { %p2184_p3 = scmp.ne.s32.totalorder %s55_s5, %s2183_s0  ;;  %p2188_p4 = scmp.lt.s32.totalorder %s55_s5, %s55_s5 }
  0x85   :  { %p2189_p5 = scmp.lt.s32.totalorder %s2187_s15, %s2183_s0 }
  0x87   :  { %p2190_p6 = por %p2189_p5, %p2188_p4 }
  0x89   :  { %p2191_p7 = pnand %p2190_p6, %p2184_p3 }
  0x8b   :  { %2194 = shalt.err (!%p2191_p7)
}
  0x8c   :  { %57 = dma.hbm_to_vmem [thread:$0]  %s2848_s2, 16, %s55_s5, [#allocation6]  }
  0x8d   :  { %s2195_s22 = scalar_lea.hbm %s2850_s4, 16 }
  0x8e   :  { %p2196_p8 = scmp.ne.s32.totalorder %s2850_s4, %s2195_s22  ;;  %p2199_p9 = scmp.lt.u32.totalorder %s2195_s22, %s2850_s4 }
  0x90   :  { %p2201_p10 = pnand %p2199_p9, %p2196_p8 }
  0x92   :  { %2204 = shalt.err (!%p2201_p10)
}
  0x93   :  { %s2205_s19 = scalar_lea.vmem %s77_s27, 16  ;;  %s2209_s30 = scalar_lea.vmem %s77_s27, 32 }
  0x94   :  { %p2206_p11 = scmp.ne.s32.totalorder %s77_s27, %s2205_s19  ;;  %p2210_p12 = scmp.lt.s32.totalorder %s77_s27, %s77_s27 }
  0x95   :  { %p2211_p13 = scmp.lt.s32.totalorder %s2209_s30, %s2205_s19 }
  0x97   :  { %p2212_p0 = por %p2211_p13, %p2210_p12 }
  0x99   :  { %p2213_p1 = pnand %p2212_p0, %p2206_p11 }
  0x9b   :  { %2216 = shalt.err (!%p2213_p1)
}
  0x9c   :  { %79 = dma.hbm_to_vmem [thread:$0]  %s2850_s4, 16, %s77_s27, [#allocation9]  }
  0x9d   :  { %s2356_s28 = smov [#allocation13]   ;;  %s2357_s29 = smov [#allocation16]  }
  0x9e   :  { %s98_s9 = sshll.u32 %s2356_s28, 4  ;;  %s118_s14 = sshll.u32 %s2357_s29, 4  ;;  %s99_s9 = int_to_ptr.vmem [resolvable:$true] %s98_s9  ;;  %s119_s14 = int_to_ptr.vmem [resolvable:$true] %s118_s14 }
  0x9f   :  { %s2217_s0 = scalar_lea.hbm %s2852_s6, 16 }
  0xa0   :  { %p2218_p2 = scmp.ne.s32.totalorder %s2852_s6, %s2217_s0  ;;  %p2221_p3 = scmp.lt.u32.totalorder %s2217_s0, %s2852_s6 }
  0xa2   :  { %p2223_p4 = pnand %p2221_p3, %p2218_p2 }
  0xa4   :  { %2226 = shalt.err (!%p2223_p4)
}
  0xa5   :  { %s2227_s4 = scalar_lea.vmem %s99_s9, 16  ;;  %s2231_s27 = scalar_lea.vmem %s99_s9, 32 }
  0xa6   :  { %p2228_p5 = scmp.ne.s32.totalorder %s99_s9, %s2227_s4  ;;  %p2232_p6 = scmp.lt.s32.totalorder %s99_s9, %s99_s9 }
  0xa7   :  { %p2233_p7 = scmp.lt.s32.totalorder %s2231_s27, %s2227_s4 }
  0xa9   :  { %p2234_p8 = por %p2233_p7, %p2232_p6 }
  0xab   :  { %p2235_p9 = pnand %p2234_p8, %p2228_p5 }
  0xad   :  { %2238 = shalt.err (!%p2235_p9)
}
  0xae   :  { %101 = dma.hbm_to_vmem [thread:$0]  %s2852_s6, 16, %s99_s9, [#allocation12]  }
  0xaf   :  { %s2239_s24 = scalar_lea.hbm %s2854_s8, 16 }
  0xb0   :  { %p2240_p10 = scmp.ne.s32.totalorder %s2854_s8, %s2239_s24  ;;  %p2243_p11 = scmp.lt.u32.totalorder %s2239_s24, %s2854_s8 }
  0xb2   :  { %p2245_p12 = pnand %p2243_p11, %p2240_p10 }
  0xb4   :  { %2248 = shalt.err (!%p2245_p12)
}
  0xb5   :  { %s2249_s5 = scalar_lea.vmem %s119_s14, 16  ;;  %s2253_s28 = scalar_lea.vmem %s119_s14, 32 }
  0xb6   :  { %p2250_p13 = scmp.ne.s32.totalorder %s119_s14, %s2249_s5  ;;  %p2254_p0 = scmp.lt.s32.totalorder %s119_s14, %s119_s14 }
  0xb7   :  { %p2255_p1 = scmp.lt.s32.totalorder %s2253_s28, %s2249_s5 }
  0xb9   :  { %p2256_p2 = por %p2255_p1, %p2254_p0 }
  0xbb   :  { %p2257_p3 = pnand %p2256_p2, %p2250_p13 }
  0xbd   :  { %2260 = shalt.err (!%p2257_p3)
}
  0xbe   :  { %121 = dma.hbm_to_vmem [thread:$0]  %s2854_s8, 16, %s119_s14, [#allocation15]  }
  0xbf   :  { %s2358_s29 = smov [#allocation19]   ;;  %s2359_s17 = smov [#allocation22]  }
  0xc0   :  { %s140_s16 = sshll.u32 %s2358_s29, 4  ;;  %s162_s0 = sshll.u32 %s2359_s17, 4  ;;  %s141_s16 = int_to_ptr.vmem [resolvable:$true] %s140_s16  ;;  %s163_s0 = int_to_ptr.vmem [resolvable:$true] %s162_s0 }
  0xc1   :  { %s2261_s20 = scalar_lea.hbm %s2856_s10, 16 }
  0xc2   :  { %p2262_p4 = scmp.ne.s32.totalorder %s2856_s10, %s2261_s20  ;;  %p2265_p5 = scmp.lt.u32.totalorder %s2261_s20, %s2856_s10 }
  0xc4   :  { %p2267_p6 = pnand %p2265_p5, %p2262_p4 }
  0xc6   :  { %2270 = shalt.err (!%p2267_p6)
}
  0xc7   :  { %s2271_s8 = scalar_lea.vmem %s141_s16, 16  ;;  %s2275_s14 = scalar_lea.vmem %s141_s16, 32 }
  0xc8   :  { %p2272_p7 = scmp.ne.s32.totalorder %s141_s16, %s2271_s8  ;;  %p2276_p8 = scmp.lt.s32.totalorder %s141_s16, %s141_s16 }
  0xc9   :  { %p2277_p9 = scmp.lt.s32.totalorder %s2275_s14, %s2271_s8 }
  0xcb   :  { %p2278_p10 = por %p2277_p9, %p2276_p8 }
  0xcd   :  { %p2279_p11 = pnand %p2278_p10, %p2272_p7 }
  0xcf   :  { %2282 = shalt.err (!%p2279_p11)
}
  0xd0   :  { %143 = dma.hbm_to_vmem [thread:$0]  %s2856_s10, 16, %s141_s16, [#allocation18]  }
  0xd1   :  { %s2283_s25 = scalar_lea.hbm %s2858_s12, 16 }
  0xd2   :  { %p2284_p12 = scmp.ne.s32.totalorder %s2858_s12, %s2283_s25  ;;  %p2287_p13 = scmp.lt.u32.totalorder %s2283_s25, %s2858_s12 }
  0xd4   :  { %p2289_p0 = pnand %p2287_p13, %p2284_p12 }
  0xd6   :  { %2292 = shalt.err (!%p2289_p0)
}
  0xd7   :  { %s2293_s28 = scalar_lea.vmem %s163_s0, 16  ;;  %s2297_s6 = scalar_lea.vmem %s163_s0, 32 }
  0xd8   :  { %p2294_p1 = scmp.ne.s32.totalorder %s163_s0, %s2293_s28  ;;  %p2298_p2 = scmp.lt.s32.totalorder %s163_s0, %s163_s0 }
  0xd9   :  { %p2299_p3 = scmp.lt.s32.totalorder %s2297_s6, %s2293_s28 }
  0xdb   :  { %p2300_p4 = por %p2299_p3, %p2298_p2 }
  0xdd   :  { %p2301_p5 = pnand %p2300_p4, %p2294_p1 }
  0xdf   :  { %2304 = shalt.err (!%p2301_p5)
}
  0xe0   :  { %165 = dma.hbm_to_vmem [thread:$0]  %s2858_s12, 16, %s163_s0, [#allocation21]  }
  0xe1   :  { %2327 = dma.done.wait [#allocation3], 1024  }
  0xe2   :  { %2328 = vsyncadd [#allocation3], 4294966272 }
  0xe3   :  { %2329 = dma.done.wait [#allocation6], 32  }
  0xe4   :  { %2330 = vsyncadd [#allocation6], 4294967264 }
  0xe5   :  { %2331 = dma.done.wait [#allocation9], 272  }
  0xe6   :  { %2332 = vsyncadd [#allocation9], 4294967024 }
  0xe7   :  { %2333 = dma.done.wait [#allocation12], 272  }
  0xe8   :  { %2334 = vsyncadd [#allocation12], 4294967024 }
  0xe9   :  { %2335 = dma.done.wait [#allocation15], 32  }
  0xea   :  { %2336 = vsyncadd [#allocation15], 4294967264 }
  0xeb   :  { %2337 = dma.done.wait [#allocation18], 272  }
  0xec   :  { %2338 = vsyncadd [#allocation18], 4294967024 }
  0xed   :  { %2339 = dma.done.wait [#allocation21], 528  }
  0xee   :  { %2340 = vsyncadd [#allocation21], 4294966768  ;;  %v243_v0 = vld [vmem:[#allocation2 + $0x20] sm:$0xff]  ;;  %v244_v2 = vld [vmem:[#allocation2 + $0x28] sm:$0xff]  ;;  %vm281_vm0 = vcmask 261120   ;;  %v2360_v23 = vmov 0.0  }
  0xef   :  { %v206_v1 = vld [vmem:[#allocation2] sm:$0xff]  ;;  %247 = vxpose.xlu1.b32.start [1/4] (short) (narrow) %v243_v0, 8  ;;  %v207_v3 = vld [vmem:[#allocation2 + $0x8] sm:$0xff]  ;;  %v245_v4 = vld [vmem:[#allocation2 + $0x30] sm:$0xff]  ;;  %1782 = vmatprep.subr.bf16.mxu0 %v2360_v23  ;;  %vm2361_vm1 = vmmov 0   ;;  %s2362_s12 = smov 96  }
  0xf0   :  { %210 = vxpose.xlu0.b32.start [1/4] (short) (narrow) %v206_v1, 8  ;;  %v208_v5 = vld [vmem:[#allocation2 + $0x10] sm:$0xff]  ;;  %v246_v6 = vld [vmem:[#allocation2 + $0x38] sm:$0xff]  ;;  %v1961_v22 = vld [vmem:[#allocation8] sm:$0xff]   ;;  %1790 = vmatprep.subr.bf16.mxu1 %v2360_v23  ;;  %vm401_vm2 = vcmask 64512   ;;  %vm525_vm3 = vcmask 1043456  }
  0xf1   :  { %v209_v7 = vld [vmem:[#allocation2 + $0x18] sm:$0xff]  ;;  %1783 = vmatpush3.bf16.msra.mxu0 %v1961_v22  ;;  %v1962_v24 = vld [vmem:[#allocation8 + $0x8] sm:$0xff]   ;;  %1786 = vmatprep.mubr.msk.bf16.mxu0 %vm2361_vm1, %v2360_v23  ;;  %v1694_v33 = vld [vmem:[#allocation5] ss:$0 sm:$0xff]  ;;  %s2364_s29 = smov 120   ;;  %s2365_s16 = smov 56  }
  0xf2   :  { %1784 = vmatprep.subr.bf16.mxu0 %v2360_v23  ;;  %1792 = vmatprep.mubr.msk.bf16.mxu1 %vm2361_vm1, %v2360_v23  ;;  %v1695_v37 = vld [vmem:[#allocation7] ss:$0 sm:$0xff]  ;;  %v1696_v42 = vld [vmem:[#allocation10] ss:$0 sm:$0xff]  ;;  %s2366_s17 = smov 80   ;;  %s2367_s0 = smov 112  }
  0xf3   :  { %248 = vxpose.xlu1.b32.cont [2/4] (short) (narrow) %v244_v2, 8  ;;  %s2368_s15 = smov 48   ;;  %s2369_s18 = smov 72   ;;  %vm1303_vm4 = vcmask 130048   ;;  %vm1306_vm5 = vcmask 195584   ;;  %vm1541_vm6 = vcmask 523264  }
  0xf4   :  { %211 = vxpose.xlu0.b32.cont [2/4] (short) (narrow) %v207_v3, 8  ;;  %s2370_s20 = smov 104   ;;  %s2371_s7 = smov 40  }
  0xf5   :  { %1785 = vmatpush3.bf16.msra.mxu0 %v1962_v24  ;;  %s2372_s4 = smov 16   ;;  %s2373_s27 = smov 24  }
  0xf6   :  { %1796 = vmatprep.subr.bf16.mxu0 %v2360_v23  ;;  %s2374_s21 = smov [#allocation23]  }
  0xf7   :  { %249 = vxpose.xlu1.b32.cont [3/4] (short) (narrow) %v245_v4, 8  ;;  %s1676_s8 = sshll.u32 %s2374_s21, 4  ;;  %s1677_s8 = int_to_ptr.vmem [resolvable:$true] %s1676_s8 }
  0xf8   :  { %212 = vxpose.xlu0.b32.cont [3/4] (short) (narrow) %v208_v5, 8  ;;  %s2305_s14 = scalar_lea.vmem %s1677_s8, 1024  ;;  %p2310_p7 = scmp.lt.s32.totalorder %s1677_s8, %s1677_s8 }
  0xf9   :  { %p2306_p6 = scmp.ne.s32.totalorder %s1677_s8, %s2305_s14  ;;  %p2311_p8 = scmp.lt.s32.totalorder %s2305_s14, %s2305_s14 }
  0xfb   :  { %250 = vxpose.xlu1.b32.end [4/4] (short) (narrow) %v246_v6, 8  ;;  %p2312_p9 = por %p2311_p8, %p2310_p7 }
  0xfc   :  { %213 = vxpose.xlu0.b32.end [4/4] (short) (narrow) %v209_v7, 8 }
  0xfd   :  { %p2313_p10 = pnand %p2312_p9, %p2306_p6 }
 0x16f   :  { %v2630_v8 = vpop.trf.xlu1 }
 0x170   :  { %v2632_v9 = vpop.trf.xlu0  ;;  %v285_v10 = vsel %vm281_vm0, %v2630_v8, 0.0 }
 0x171   :  { %v282_v11 = vsel %vm281_vm0, %v2632_v9, 0.0  ;;  %286 = vadd.xlane.f32.xlu1 %v285_v10 }
 0x172   :  { %283 = vadd.xlane.f32.xlu0 %v282_v11 }
 0x1fe   :  { %v287_v12 = vpop.xlane.xlu1 %286 }
 0x1ff   :  { %v284_v13 = vpop.xlane.xlu0 %283  ;;  %v290_v14 = vmul.f32 0.03125, %v287_v12 }
 0x200   :  { %v289_v15 = vmul.f32 0.03125, %v284_v13 }
 0x201   :  { %v292_v16 = vsub.f32 %v2630_v8, %v290_v14 }
 0x202   :  { %v291_v17 = vsub.f32 %v2632_v9, %v289_v15 }
 0x203   :  { %v294_v20 = vmul.f32 %v292_v16, %v292_v16 }
 0x204   :  { %v293_v18 = vmul.f32 %v291_v17, %v291_v17 }
 0x205   :  { %v298_v21 = vsel %vm281_vm0, %v294_v20, 0.0 }
 0x206   :  { %v295_v19 = vsel %vm281_vm0, %v293_v18, 0.0 }
 0x207   :  { %296 = vadd.xlane.f32.xlu1 %v295_v19 }
 0x20b   :  { %299 = vadd.xlane.f32.xlu1 %v298_v21 }
 0x294   :  { %v297_v25 = vpop.xlane.xlu1 %296 }
 0x295   :  { %v301_v26 = vmul.f32 0.03125, %v297_v25 }
 0x297   :  { %v303_v27 = vadd.f32 1e-05, %v301_v26 }
 0x298   :  { %v300_v28 = vpop.xlane.xlu1 %299 }
 0x299   :  { %1971 = vrsqrt.f32 %v303_v27  ;;  %v302_v29 = vmul.f32 0.03125, %v300_v28 }
 0x29b   :  { %v304_v30 = vadd.f32 1e-05, %v302_v29 }
 0x29d   :  { %1973 = vrsqrt.f32 %v304_v30 }
 0x2a3   :  { %v1972_v31 = vpop.eup %1971 }
 0x2a4   :  { %v307_v32 = vmul.f32 %v1972_v31, %v291_v17 }
 0x2a6   :  { %v315_v36 = vmul.f32 %v1694_v33, %v307_v32 }
 0x2a7   :  { %v1974_v34 = vpop.eup %1973 }
 0x2a8   :  { %v308_v35 = vmul.f32 %v1974_v34, %v292_v16  ;;  %v323_v39 = vadd.f32 %v1695_v37, %v315_v36 }
 0x2aa   :  { %v316_v38 = vmul.f32 %v1694_v33, %v308_v35 }
 0x2ac   :  { %v324_v40 = vadd.f32 %v1695_v37, %v316_v38 }
 0x2ae   :  { %v325_v41 = vpack.c.bf16 %v324_v40, %v323_v39 }
 0x2b0   :  { %1787 = vmatmul.mubr.msk.bf16.vlgmr.msra.gmra.mrb[0].mxu0 %vm281_vm0, %v325_v41 }
 0x2b1   :  { %1798 = vmatprep.mubr.msk.bf16.mxu0 %vm2361_vm1, %v2360_v23 }
 0x383   :  { %v386_v43 = vpop.f32.mrb[0].mxu0 }
 0x384   :  { %v387_v44 = vadd.f32 %v1696_v42, %v386_v43  ;;  %v1788_v45 = vpop.f32.mrb[1].mxu0 }
 0x385   :  { %v389_v46 = vpop.f32.mrb[2].mxu0 }
 0x386   :  { %v2653_v47 = vpack.c.bf16 %v387_v44, %v387_v44  ;;  %v390_v48 = vadd.f32 %v1696_v42, %v389_v46  ;;  %v1789_v49 = vpop.f32.mrb[3].mxu0 }
 0x388   :  { %v2655_v50 = vpack.c.bf16 %v390_v48, %v390_v48  ;;  %399 = vrot.lane.b32.xlu0 %v2653_v47, %s2362_s12 }
 0x38a   :  { %448 = vrot.lane.b32.xlu1 %v2655_v50, %s2362_s12 }
 0x3fa   :  { %v400_v51 = vpop.permute.xlu0 %399 }
 0x3fb   :  { %v406_v52 = vsel %vm401_vm2, %v400_v51, 0 }
 0x3fc   :  { %1791 = vmatpush3.bf16.xpose.msra.mxu1 %v406_v52  ;;  %v449_v53 = vpop.permute.xlu1 %448 }
 0x3fd   :  { %v454_v54 = vsel %vm401_vm2, %v449_v53, 0  ;;  %1802 = vmatprep.subr.bf16.mxu1 %v2360_v23 }
 0x3fe   :  { %1797 = vmatpush3.bf16.xpose.msra.mxu0 %v454_v54 }
 0x3ff   :  { %1808 = vmatprep.subr.bf16.mxu0 %v2360_v23 }
 0x403   :  { %1793 = vmatmul.mubr.msk.bf16.vlgmr.msra.gmra.mrb[0].mxu1 %vm401_vm2, %v2653_v47 }
 0x404   :  { %1804 = vmatprep.mubr.msk.bf16.mxu1 %vm2361_vm1, %v2360_v23 }
 0x405   :  { %1799 = vmatmul.mubr.msk.bf16.vlgmr.msra.gmra.mrb[4].mxu0 %vm401_vm2, %v2655_v50 }
 0x406   :  { %1810 = vmatprep.mubr.msk.bf16.mxu0 %vm2361_vm1, %v2360_v23 }
 0x4d6   :  { %v442_v55 = vpop.f32.mrb[0].mxu1 }
 0x4d7   :  { %v1794_v56 = vpop.f32.mrb[1].mxu1  ;;  %v496_v57 = vsel %vm401_vm2, %v442_v55, -inf }
 0x4d8   :  { %v445_v58 = vpop.f32.mrb[2].mxu1  ;;  %497 = vmax.xlane.f32.xlu1 %v496_v57  ;;  %v490_v59 = vpop.f32.mrb[4].mxu0 }
 0x4d9   :  { %v1795_v60 = vpop.f32.mrb[3].mxu1  ;;  %v1800_v61 = vpop.f32.mrb[5].mxu0  ;;  %v499_v62 = vsel %vm401_vm2, %v490_v59, -inf }
 0x4da   :  { %500 = vmax.xlane.f32.xlu0 %v499_v62  ;;  %v493_v63 = vpop.f32.mrb[6].mxu0 }
 0x4db   :  { %v1801_v0 = vpop.f32.mrb[7].mxu0 }
 0x4e9   :  { %569 = vrot.lane.b32.xlu1 %v2655_v50, %s2345_s1 }
 0x4f0   :  { %520 = vrot.lane.b32.xlu0 %v2653_v47, %s2345_s1  ;;  %s2363_s1 = smov 88  }
 0x565   :  { %v498_v1 = vpop.xlane.xlu1 %497 }
 0x566   :  { %v502_v2 = vsub.f32 %v442_v55, %v498_v1 }
 0x567   :  { %v501_v3 = vpop.xlane.xlu0 %500 }
 0x568   :  { %v504_v4 = vmul.f32 1.442695, %v502_v2  ;;  %v503_v5 = vsub.f32 %v490_v59, %v501_v3 }
 0x569   :  { %v570_v6 = vpop.permute.xlu1 %569 }
 0x56a   :  { %1975 = vpow2.f32 %v504_v4  ;;  %v506_v7 = vmul.f32 1.442695, %v503_v5  ;;  %v575_v10 = vsel %vm525_vm3, %v570_v6, 0 }
 0x56b   :  { %1809 = vmatpush3.bf16.msra.mxu0 %v575_v10  ;;  %v521_v11 = vpop.permute.xlu0 %520 }
 0x56c   :  { %1977 = vpow2.f32 %v506_v7  ;;  %v527_v12 = vsel %vm525_vm3, %v521_v11, 0  ;;  %1820 = vmatprep.subr.bf16.mxu0 %v2360_v23 }
 0x56d   :  { %1803 = vmatpush3.bf16.msra.mxu1 %v527_v12 }
 0x56e   :  { %1814 = vmatprep.subr.bf16.mxu1 %v2360_v23 }
 0x574   :  { %v1976_v13 = vpop.eup %1975 }
 0x575   :  { %v508_v14 = vsel %vm401_vm2, %v1976_v13, 0.0 }
 0x576   :  { %v1978_v15 = vpop.eup %1977  ;;  %509 = vadd.xlane.f32.xlu0 %v508_v14 }
 0x577   :  { %v511_v16 = vsel %vm401_vm2, %v1978_v15, 0.0 }
 0x578   :  { %512 = vadd.xlane.f32.xlu1 %v511_v16 }
 0x589   :  { %619 = vrot.lane.b32.xlu1 %v2653_v47, %s2363_s1 }
 0x58c   :  { %669 = vrot.lane.b32.xlu0 %v2655_v50, %s2363_s1 }
 0x58d   :  { %617 = vrot.lane.b32.xlu1 %v2653_v47, %s2364_s29 }
 0x590   :  { %667 = vrot.lane.b32.xlu0 %v2655_v50, %s2364_s29 }
 0x603   :  { %v510_v17 = vpop.xlane.xlu0 %509 }
 0x604   :  { %1979 = vrcp.f32 %v510_v17 }
 0x605   :  { %v513_v18 = vpop.xlane.xlu1 %512 }
 0x606   :  { %1981 = vrcp.f32 %v513_v18 }
 0x607   :  { %v670_v26 = vpop.permute.xlu0 %669 }
 0x608   :  { %v675_v29 = vsel %vm401_vm2, %v670_v26, 0 }
 0x609   :  { %v620_v22 = vpop.permute.xlu1 %619 }
 0x60a   :  { %v625_v27 = vsel %vm401_vm2, %v620_v22, 0 }
 0x60b   :  { %v668_v31 = vpop.permute.xlu0 %667 }
 0x60d   :  { %v618_v30 = vpop.permute.xlu1 %617 }
 0x60e   :  { %v1980_v19 = vpop.eup %1979 }
 0x60f   :  { %v516_v20 = vmul.f32 %v1980_v19, %v1976_v13 }
 0x610   :  { %v1982_v21 = vpop.eup %1981 }
 0x611   :  { %v517_v24 = vmul.f32 %v1982_v21, %v1978_v15  ;;  %v518_v25 = vpack.c.bf16 %v516_v20, %v516_v20 }
 0x613   :  { %1805 = vmatmul.mubr.msk.bf16.vlgmr.msra.gmra.mrb[4].mxu1 %vm401_vm2, %v518_v25  ;;  %v519_v28 = vpack.c.bf16 %v517_v24, %v517_v24 }
 0x614   :  { %1815 = vmatpush3.bf16.xpose.msra.mxu1 %v625_v27  ;;  %1816 = vmatprep.mubr.msk.bf16.mxu1 %vm2361_vm1, %v2360_v23 }
 0x615   :  { %1811 = vmatmul.mubr.msk.bf16.vlgmr.msra.gmra.mrb[8].mxu0 %vm401_vm2, %v519_v28  ;;  %1826 = vmatprep.subr.bf16.mxu1 %v2360_v23 }
 0x616   :  { %1821 = vmatpush3.bf16.xpose.msra.mxu0 %v675_v29  ;;  %1822 = vmatprep.mubr.msk.bf16.mxu0 %vm2361_vm1, %v2360_v23 }
 0x617   :  { %1832 = vmatprep.subr.bf16.mxu0 %v2360_v23 }
 0x61b   :  { %1817 = vmatmul.mubr.msk.bf16.vlgmr.msra.gmra.mrb[8].mxu1 %vm401_vm2, %v618_v30 }
 0x61c   :  { %1828 = vmatprep.mubr.msk.bf16.mxu1 %vm2361_vm1, %v2360_v23 }
 0x61d   :  { %1823 = vmatmul.mubr.msk.bf16.vlgmr.msra.gmra.mrb[12].mxu0 %vm401_vm2, %v668_v31 }
 0x61e   :  { %1834 = vmatprep.mubr.msk.bf16.mxu0 %vm2361_vm1, %v2360_v23 }
 0x6e6   :  { %v2703_v32 = vpop.f32.mrb[4].mxu1 }
 0x6e7   :  { %v1806_v33 = vpop.f32.mrb[5].mxu1 }
 0x6e8   :  { %v566_v34 = vpop.f32.mrb[6].mxu1  ;;  %v2705_v35 = vpop.f32.mrb[8].mxu0 }
 0x6e9   :  { %v1807_v36 = vpop.f32.mrb[7].mxu1  ;;  %v1812_v37 = vpop.f32.mrb[9].mxu0 }
 0x6ea   :  { %v614_v38 = vpop.f32.mrb[10].mxu0 }
 0x6eb   :  { %v1813_v39 = vpop.f32.mrb[11].mxu0 }
 0x6ee   :  { %v661_v40 = vpop.f32.mrb[8].mxu1 }
 0x6ef   :  { %v1818_v41 = vpop.f32.mrb[9].mxu1  ;;  %v717_v42 = vsel %vm401_vm2, %v661_v40, -inf }
 0x6f0   :  { %718 = vmax.xlane.f32.xlu1 %v717_v42  ;;  %v664_v43 = vpop.f32.mrb[10].mxu1  ;;  %v711_v44 = vpop.f32.mrb[12].mxu0 }
 0x6f1   :  { %v1819_v45 = vpop.f32.mrb[11].mxu1  ;;  %v1824_v46 = vpop.f32.mrb[13].mxu0  ;;  %v720_v48 = vsel %vm401_vm2, %v711_v44, -inf }
 0x6f2   :  { %721 = vmax.xlane.f32.xlu0 %v720_v48  ;;  %v714_v49 = vpop.f32.mrb[14].mxu0 }
 0x6f3   :  { %v1825_v51 = vpop.f32.mrb[15].mxu0 }
 0x701   :  { %789 = vrot.lane.b32.xlu1 %v2655_v50, %s2365_s16 }
 0x708   :  { %741 = vrot.lane.b32.xlu0 %v2653_v47, %s2365_s16 }
 0x77d   :  { %v719_v52 = vpop.xlane.xlu1 %718 }
 0x77e   :  { %v723_v53 = vsub.f32 %v661_v40, %v719_v52 }
 0x77f   :  { %v722_v54 = vpop.xlane.xlu0 %721 }
 0x780   :  { %v725_v55 = vmul.f32 1.442695, %v723_v53  ;;  %v724_v56 = vsub.f32 %v711_v44, %v722_v54 }
 0x781   :  { %v790_v57 = vpop.permute.xlu1 %789 }
 0x782   :  { %1983 = vpow2.f32 %v725_v55  ;;  %v727_v58 = vmul.f32 1.442695, %v724_v56  ;;  %v795_v59 = vsel %vm525_vm3, %v790_v57, 0 }
 0x783   :  { %1833 = vmatpush3.bf16.msra.mxu0 %v795_v59  ;;  %v742_v60 = vpop.permute.xlu0 %741 }
 0x784   :  { %1985 = vpow2.f32 %v727_v58  ;;  %v747_v61 = vsel %vm525_vm3, %v742_v60, 0  ;;  %1844 = vmatprep.subr.bf16.mxu0 %v2360_v23 }
 0x785   :  { %1827 = vmatpush3.bf16.msra.mxu1 %v747_v61 }
 0x786   :  { %1838 = vmatprep.subr.bf16.mxu1 %v2360_v23 }
 0x78c   :  { %v1984_v62 = vpop.eup %1983 }
 0x78d   :  { %v729_v63 = vsel %vm401_vm2, %v1984_v62, 0.0 }
 0x78e   :  { %v1986_v0 = vpop.eup %1985  ;;  %730 = vadd.xlane.f32.xlu0 %v729_v63 }
 0x78f   :  { %v732_v1 = vsel %vm401_vm2, %v1986_v0, 0.0 }
 0x790   :  { %733 = vadd.xlane.f32.xlu1 %v732_v1 }
 0x7a1   :  { %839 = vrot.lane.b32.xlu1 %v2653_v47, %s2366_s17 }
 0x7a4   :  { %889 = vrot.lane.b32.xlu0 %v2655_v50, %s2366_s17 }
 0x7a5   :  { %837 = vrot.lane.b32.xlu1 %v2653_v47, %s2367_s0 }
 0x7a8   :  { %887 = vrot.lane.b32.xlu0 %v2655_v50, %s2367_s0 }
 0x81b   :  { %v731_v2 = vpop.xlane.xlu0 %730 }
 0x81c   :  { %1987 = vrcp.f32 %v731_v2 }
 0x81d   :  { %v734_v3 = vpop.xlane.xlu1 %733 }
 0x81e   :  { %1989 = vrcp.f32 %v734_v3 }
 0x81f   :  { %v890_v12 = vpop.permute.xlu0 %889 }
 0x820   :  { %v895_v15 = vsel %vm401_vm2, %v890_v12, 0 }
 0x821   :  { %v840_v7 = vpop.permute.xlu1 %839 }
 0x822   :  { %v845_v13 = vsel %vm401_vm2, %v840_v7, 0 }
 0x823   :  { %v888_v17 = vpop.permute.xlu0 %887 }
 0x825   :  { %v838_v16 = vpop.permute.xlu1 %837 }
 0x826   :  { %v1988_v4 = vpop.eup %1987 }
 0x827   :  { %v737_v5 = vmul.f32 %v1988_v4, %v1984_v62 }
 0x828   :  { %v1990_v6 = vpop.eup %1989 }
 0x829   :  { %v738_v10 = vmul.f32 %v1990_v6, %v1986_v0  ;;  %v739_v11 = vpack.c.bf16 %v737_v5, %v737_v5 }
 0x82b   :  { %1829 = vmatmul.mubr.msk.bf16.vlgmr.msra.gmra.mrb[12].mxu1 %vm401_vm2, %v739_v11  ;;  %v740_v14 = vpack.c.bf16 %v738_v10, %v738_v10 }
 0x82c   :  { %1839 = vmatpush3.bf16.xpose.msra.mxu1 %v845_v13  ;;  %1840 = vmatprep.mubr.msk.bf16.mxu1 %vm2361_vm1, %v2360_v23 }
 0x82d   :  { %1835 = vmatmul.mubr.msk.bf16.vlgmr.msra.gmra.mrb[16].mxu0 %vm401_vm2, %v740_v14  ;;  %1850 = vmatprep.subr.bf16.mxu1 %v2360_v23 }
 0x82e   :  { %1845 = vmatpush3.bf16.xpose.msra.mxu0 %v895_v15  ;;  %1846 = vmatprep.mubr.msk.bf16.mxu0 %vm2361_vm1, %v2360_v23 }
 0x82f   :  { %1856 = vmatprep.subr.bf16.mxu0 %v2360_v23 }
 0x833   :  { %1841 = vmatmul.mubr.msk.bf16.vlgmr.msra.gmra.mrb[16].mxu1 %vm401_vm2, %v838_v16 }
 0x834   :  { %1852 = vmatprep.mubr.msk.bf16.mxu1 %vm2361_vm1, %v2360_v23 }
 0x835   :  { %1847 = vmatmul.mubr.msk.bf16.vlgmr.msra.gmra.mrb[20].mxu0 %vm401_vm2, %v888_v17 }
 0x836   :  { %1858 = vmatprep.mubr.msk.bf16.mxu0 %vm2361_vm1, %v2360_v23 }
 0x8fe   :  { %v2737_v18 = vpop.f32.mrb[12].mxu1 }
 0x8ff   :  { %v1830_v19 = vpop.f32.mrb[13].mxu1 }
 0x900   :  { %v786_v20 = vpop.f32.mrb[14].mxu1  ;;  %v2739_v21 = vpop.f32.mrb[16].mxu0 }
 0x901   :  { %v1946_v22 = vpack.i.bf16 %v2739_v21, %v2737_v18  ;;  %v1831_v24 = vpop.f32.mrb[15].mxu1  ;;  %v1836_v25 = vpop.f32.mrb[17].mxu0 }
 0x902   :  { %v834_v26 = vpop.f32.mrb[18].mxu0 }
 0x903   :  { %v1837_v27 = vpop.f32.mrb[19].mxu0 }
 0x906   :  { %v881_v28 = vpop.f32.mrb[16].mxu1 }
 0x907   :  { %v1842_v29 = vpop.f32.mrb[17].mxu1  ;;  %v937_v30 = vsel %vm401_vm2, %v881_v28, -inf }
 0x908   :  { %938 = vmax.xlane.f32.xlu1 %v937_v30  ;;  %v884_v31 = vpop.f32.mrb[18].mxu1  ;;  %v931_v33 = vpop.f32.mrb[20].mxu0 }
 0x909   :  { %v1843_v34 = vpop.f32.mrb[19].mxu1  ;;  %v1848_v36 = vpop.f32.mrb[21].mxu0  ;;  %v940_v37 = vsel %vm401_vm2, %v931_v33, -inf }
 0x90a   :  { %941 = vmax.xlane.f32.xlu0 %v940_v37  ;;  %v934_v38 = vpop.f32.mrb[22].mxu0 }
 0x90b   :  { %v1849_v39 = vpop.f32.mrb[23].mxu0 }
 0x919   :  { %1009 = vrot.lane.b32.xlu1 %v2655_v50, %s2368_s15 }
 0x920   :  { %961 = vrot.lane.b32.xlu0 %v2653_v47, %s2368_s15 }
 0x995   :  { %v939_v40 = vpop.xlane.xlu1 %938 }
 0x996   :  { %v943_v41 = vsub.f32 %v881_v28, %v939_v40 }
 0x997   :  { %v942_v42 = vpop.xlane.xlu0 %941 }
 0x998   :  { %v945_v43 = vmul.f32 1.442695, %v943_v41  ;;  %v944_v44 = vsub.f32 %v931_v33, %v942_v42 }
 0x999   :  { %v1010_v45 = vpop.permute.xlu1 %1009 }
 0x99a   :  { %1991 = vpow2.f32 %v945_v43  ;;  %v947_v46 = vmul.f32 1.442695, %v944_v44  ;;  %v1015_v48 = vsel %vm525_vm3, %v1010_v45, 0 }
 0x99b   :  { %1857 = vmatpush3.bf16.msra.mxu0 %v1015_v48  ;;  %v962_v49 = vpop.permute.xlu0 %961 }
 0x99c   :  { %1993 = vpow2.f32 %v947_v46  ;;  %v967_v51 = vsel %vm525_vm3, %v962_v49, 0  ;;  %1868 = vmatprep.subr.bf16.mxu0 %v2360_v23 }
 0x99d   :  { %1851 = vmatpush3.bf16.msra.mxu1 %v967_v51 }
 0x99e   :  { %1862 = vmatprep.subr.bf16.mxu1 %v2360_v23 }
 0x9a4   :  { %v1992_v52 = vpop.eup %1991 }
 0x9a5   :  { %v949_v53 = vsel %vm401_vm2, %v1992_v52, 0.0 }
 0x9a6   :  { %v1994_v54 = vpop.eup %1993  ;;  %950 = vadd.xlane.f32.xlu0 %v949_v53  ;;  %v1964_v53 = vld [vmem:[#allocation11 + $0x8] sm:$0xff]  }
 0x9a7   :  { %v952_v55 = vsel %vm401_vm2, %v1994_v54, 0.0 }
 0x9a8   :  { %953 = vadd.xlane.f32.xlu1 %v952_v55 }
 0x9b9   :  { %1059 = vrot.lane.b32.xlu1 %v2653_v47, %s2369_s18 }
 0x9bc   :  { %1109 = vrot.lane.b32.xlu0 %v2655_v50, %s2369_s18 }
 0x9bd   :  { %1057 = vrot.lane.b32.xlu1 %v2653_v47, %s2370_s20 }
 0x9c0   :  { %1107 = vrot.lane.b32.xlu0 %v2655_v50, %s2370_s20 }
 0xa33   :  { %v951_v56 = vpop.xlane.xlu0 %950 }
 0xa34   :  { %1995 = vrcp.f32 %v951_v56 }
 0xa35   :  { %v954_v57 = vpop.xlane.xlu1 %953 }
 0xa36   :  { %1997 = vrcp.f32 %v954_v57 }
 0xa37   :  { %v1110_v0 = vpop.permute.xlu0 %1109 }
 0xa38   :  { %v1115_v3 = vsel %vm401_vm2, %v1110_v0, 0 }
 0xa39   :  { %v1060_v61 = vpop.permute.xlu1 %1059 }
 0xa3a   :  { %v1065_v1 = vsel %vm401_vm2, %v1060_v61, 0 }
 0xa3b   :  { %v1108_v5 = vpop.permute.xlu0 %1107 }
 0xa3d   :  { %v1058_v4 = vpop.permute.xlu1 %1057 }
 0xa3e   :  { %v1996_v58 = vpop.eup %1995 }
 0xa3f   :  { %v957_v59 = vmul.f32 %v1996_v58, %v1992_v52  ;;  %v1963_v52 = vld [vmem:[#allocation11] sm:$0xff]  }
 0xa40   :  { %v1998_v60 = vpop.eup %1997 }
 0xa41   :  { %v958_v62 = vmul.f32 %v1998_v60, %v1994_v54  ;;  %v959_v63 = vpack.c.bf16 %v957_v59, %v957_v59 }
 0xa43   :  { %1853 = vmatmul.mubr.msk.bf16.vlgmr.msra.gmra.mrb[20].mxu1 %vm401_vm2, %v959_v63  ;;  %v960_v2 = vpack.c.bf16 %v958_v62, %v958_v62 }
 0xa44   :  { %1863 = vmatpush3.bf16.xpose.msra.mxu1 %v1065_v1  ;;  %1864 = vmatprep.mubr.msk.bf16.mxu1 %vm2361_vm1, %v2360_v23 }
 0xa45   :  { %1859 = vmatmul.mubr.msk.bf16.vlgmr.msra.gmra.mrb[24].mxu0 %vm401_vm2, %v960_v2  ;;  %1874 = vmatprep.subr.bf16.mxu1 %v2360_v23 }
 0xa46   :  { %1869 = vmatpush3.bf16.xpose.msra.mxu0 %v1115_v3  ;;  %1870 = vmatprep.mubr.msk.bf16.mxu0 %vm2361_vm1, %v2360_v23 }
 0xa47   :  { %1880 = vmatprep.subr.bf16.mxu0 %v2360_v23 }
 0xa4b   :  { %1865 = vmatmul.mubr.msk.bf16.vlgmr.msra.gmra.mrb[24].mxu1 %vm401_vm2, %v1058_v4 }
 0xa4c   :  { %1876 = vmatprep.mubr.msk.bf16.mxu1 %vm2361_vm1, %v2360_v23 }
 0xa4d   :  { %1871 = vmatmul.mubr.msk.bf16.vlgmr.msra.gmra.mrb[28].mxu0 %vm401_vm2, %v1108_v5 }
 0xa4e   :  { %1882 = vmatprep.mubr.msk.bf16.mxu0 %vm2361_vm1, %v2360_v23 }
 0xb16   :  { %v1003_v6 = vpop.f32.mrb[20].mxu1 }
 0xb17   :  { %v1854_v7 = vpop.f32.mrb[21].mxu1 }
 0xb18   :  { %v1006_v10 = vpop.f32.mrb[22].mxu1  ;;  %v1051_v11 = vpop.f32.mrb[24].mxu0 }
 0xb19   :  { %v1951_v12 = vpack.i.bf16 %v1051_v11, %v1003_v6  ;;  %v1855_v13 = vpop.f32.mrb[23].mxu1  ;;  %v1860_v14 = vpop.f32.mrb[25].mxu0 }
 0xb1a   :  { %v1054_v15 = vpop.f32.mrb[26].mxu0 }
 0xb1b   :  { %v1861_v16 = vpop.f32.mrb[27].mxu0 }
 0xb1e   :  { %v1101_v17 = vpop.f32.mrb[24].mxu1 }
 0xb1f   :  { %v1866_v19 = vpop.f32.mrb[25].mxu1  ;;  %v1157_v20 = vsel %vm401_vm2, %v1101_v17, -inf }
 0xb20   :  { %1158 = vmax.xlane.f32.xlu1 %v1157_v20  ;;  %v1104_v24 = vpop.f32.mrb[26].mxu1  ;;  %v1151_v25 = vpop.f32.mrb[28].mxu0 }
 0xb21   :  { %v1867_v26 = vpop.f32.mrb[27].mxu1  ;;  %v1872_v27 = vpop.f32.mrb[29].mxu0  ;;  %v1160_v28 = vsel %vm401_vm2, %v1151_v25, -inf }
 0xb22   :  { %1161 = vmax.xlane.f32.xlu0 %v1160_v28  ;;  %v1154_v29 = vpop.f32.mrb[30].mxu0 }
 0xb23   :  { %v1873_v30 = vpop.f32.mrb[31].mxu0 }
 0xbad   :  { %v1159_v31 = vpop.xlane.xlu1 %1158 }
 0xbae   :  { %v1163_v33 = vsub.f32 %v1101_v17, %v1159_v31 }
 0xbaf   :  { %v1162_v34 = vpop.xlane.xlu0 %1161 }
 0xbb0   :  { %v1165_v36 = vmul.f32 1.442695, %v1163_v33  ;;  %v1164_v37 = vsub.f32 %v1151_v25, %v1162_v34 }
 0xbb2   :  { %1999 = vpow2.f32 %v1165_v36  ;;  %v1167_v38 = vmul.f32 1.442695, %v1164_v37 }
 0xbb4   :  { %2001 = vpow2.f32 %v1167_v38 }
 0xbbc   :  { %v2000_v39 = vpop.eup %1999 }
 0xbbd   :  { %v1169_v40 = vsel %vm401_vm2, %v2000_v39, 0.0 }
 0xbbe   :  { %v2002_v41 = vpop.eup %2001  ;;  %1170 = vadd.xlane.f32.xlu0 %v1169_v40  ;;  %v1965_v40 = vld [vmem:[#allocation17] sm:$0xff]  }
 0xbbf   :  { %v1172_v42 = vsel %vm401_vm2, %v2002_v41, 0.0 }
 0xbc0   :  { %1173 = vadd.xlane.f32.xlu1 %v1172_v42 }
 0xbd1   :  { %1229 = vrot.lane.b32.xlu1 %v2655_v50, %s2371_s7 }
 0xbd4   :  { %1181 = vrot.lane.b32.xlu0 %v2653_v47, %s2371_s7 }
 0xbd5   :  { %1947 = vrot.lane.b32.xlu1 %v1946_v22, %s2353_s26 }
 0xbd8   :  { %1952 = vrot.lane.b32.xlu0 %v1951_v12, %s2372_s4 }
 0xc4b   :  { %v1171_v43 = vpop.xlane.xlu0 %1170 }
 0xc4c   :  { %2003 = vrcp.f32 %v1171_v43 }
 0xc4d   :  { %v1174_v44 = vpop.xlane.xlu1 %1173 }
 0xc4e   :  { %2005 = vrcp.f32 %v1174_v44 }
 0xc4f   :  { %v1182_v45 = vpop.permute.xlu0 %1181 }
 0xc50   :  { %v1187_v46 = vsel %vm525_vm3, %v1182_v45, 0 }
 0xc51   :  { %v1230_v48 = vpop.permute.xlu1 %1229  ;;  %1875 = vmatpush3.bf16.msra.mxu1 %v1187_v46 }
 0xc52   :  { %v1235_v50 = vsel %vm525_vm3, %v1230_v48, 0  ;;  %1886 = vmatprep.subr.bf16.mxu1 %v2360_v23 }
 0xc53   :  { %1881 = vmatpush3.bf16.msra.mxu0 %v1235_v50  ;;  %v1953_v2 = vpop.permute.xlu0 %1952 }
 0xc54   :  { %1894 = vmatprep.subr.bf16.mxu0 %v2360_v23  ;;  %v1955_v5 = vunpack.i.h.bf16 %v1953_v2  ;;  %v1954_v6 = vunpack.i.l.bf16 %v1953_v2 }
 0xc55   :  { %v1948_v63 = vpop.permute.xlu1 %1947 }
 0xc56   :  { %v2004_v47 = vpop.eup %2003  ;;  %v1950_v0 = vunpack.i.h.bf16 %v1948_v63  ;;  %v1949_v1 = vunpack.i.l.bf16 %v1948_v63 }
 0xc57   :  { %v1177_v18 = vmul.f32 %v2004_v47, %v2000_v39 }
 0xc58   :  { %v2006_v21 = vpop.eup %2005  ;;  %v1302_v3 = vsel %vm401_vm2, %v2705_v35, %v1950_v0  ;;  %v1301_v4 = vsel %vm401_vm2, %v2703_v32, %v1949_v1  ;;  %v1718_v35 = vld [vmem:[#allocation13] ss:$0 sm:$0xff] }
 0xc59   :  { %v1178_v22 = vmul.f32 %v2006_v21, %v2002_v41  ;;  %v1179_v49 = vpack.c.bf16 %v1177_v18, %v1177_v18  ;;  %v1304_v12 = vsel %vm1303_vm4, %v1301_v4, %v1954_v6  ;;  %v1305_v13 = vsel %vm1303_vm4, %v1302_v3, %v1955_v5  ;;  %v1966_v41 = vld [vmem:[#allocation17 + $0x8] sm:$0xff]   ;;  %v1722_v18 = vld [vmem:[#allocation14] ss:$0 sm:$0xff] }
 0xc5b   :  { %1877 = vmatmul.mubr.msk.bf16.vlgmr.msra.gmra.mrb[28].mxu1 %vm401_vm2, %v1179_v49  ;;  %v1180_v51 = vpack.c.bf16 %v1178_v22, %v1178_v22 }
 0xc5c   :  { %1890 = vmatprep.mubr.msk.bf16.mxu1 %vm2361_vm1, %v2360_v23  ;;  %1887 = vmatpush3.bf16.msra.mxu1 %v1963_v52 }
 0xc5d   :  { %1883 = vmatmul.mubr.msk.bf16.vlgmr.msra.gmra.mrb[32].mxu0 %vm401_vm2, %v1180_v51  ;;  %1888 = vmatprep.subr.bf16.mxu1 %v2360_v23  ;;  %v1723_v51 = vld [vmem:[#allocation16] ss:$0 sm:$0xff] }
 0xc5e   :  { %1898 = vmatprep.mubr.msk.bf16.mxu0 %vm2361_vm1, %v2360_v23  ;;  %1895 = vmatpush3.bf16.msra.mxu0 %v1965_v40 }
 0xc5f   :  { %1896 = vmatprep.subr.bf16.mxu0 %v2360_v23 }
 0xc60   :  { %1889 = vmatpush3.bf16.msra.mxu1 %v1964_v53 }
 0xc61   :  { %1902 = vmatprep.subr.bf16.mxu1 %v2360_v23 }
 0xc62   :  { %1897 = vmatpush3.bf16.msra.mxu0 %v1966_v41 }
 0xd2e   :  { %v1223_v54 = vpop.f32.mrb[28].mxu1 }
 0xd2f   :  { %v1878_v55 = vpop.f32.mrb[29].mxu1 }
 0xd30   :  { %v1226_v56 = vpop.f32.mrb[30].mxu1  ;;  %v1271_v57 = vpop.f32.mrb[32].mxu0 }
 0xd31   :  { %v1956_v58 = vpack.i.bf16 %v1271_v57, %v1223_v54  ;;  %v1879_v59 = vpop.f32.mrb[31].mxu1  ;;  %v1884_v60 = vpop.f32.mrb[33].mxu0  ;;  %v1967_v56 = vld [vmem:[#allocation20] sm:$0xff]   ;;  %v1968_v57 = vld [vmem:[#allocation20 + $0x8] sm:$0xff]  }
 0xd32   :  { %v1274_v61 = vpop.f32.mrb[34].mxu0  ;;  %v1970_v59 = vld [vmem:[#allocation20 + $0x18] sm:$0xff]  }
 0xd33   :  { %1957 = vrot.lane.b32.xlu1 %v1956_v58, %s2373_s27  ;;  %v1885_v62 = vpop.f32.mrb[35].mxu0  ;;  %v1969_v58 = vld [vmem:[#allocation20 + $0x10] sm:$0xff]   ;;  %v1724_v60 = vld [vmem:[#allocation19] ss:$0 sm:$0xff] }
 0xda5   :  { %v1958_v7 = vpop.permute.xlu1 %1957 }
 0xda6   :  { %v1960_v10 = vunpack.i.h.bf16 %v1958_v7  ;;  %v1959_v11 = vunpack.i.l.bf16 %v1958_v7 }
 0xda8   :  { %v1308_v14 = vsel %vm1306_vm5, %v1305_v13, %v1960_v10  ;;  %v1307_v15 = vsel %vm1306_vm5, %v1304_v12, %v1959_v11 }
 0xda9   :  { %v1309_v16 = vpack.c.bf16 %v1308_v14, %v1307_v15  ;;  %v1728_v15 = vld [vmem:[#allocation22] ss:$0 sm:$0xff] }
 0xdab   :  { %1891 = vmatmul.mubr.msk.bf16.vlgmr.msra.gmra.mrb[32].mxu1 %vm281_vm0, %v1309_v16 }
 0xdac   :  { %1910 = vmatprep.mubr.msk.bf16.mxu1 %vm2361_vm1, %v2360_v23  ;;  %1903 = vmatpush3.bf16.msra.mxu1 %v1967_v56 }
 0xdad   :  { %1904 = vmatprep.subr.bf16.mxu1 %v2360_v23 }
 0xdb0   :  { %1905 = vmatpush3.bf16.msra.mxu1 %v1968_v57 }
 0xdb1   :  { %1906 = vmatprep.subr.bf16.mxu1 %v2360_v23 }
 0xdb4   :  { %1907 = vmatpush3.bf16.msra.mxu1 %v1969_v58 }
 0xdb5   :  { %1908 = vmatprep.subr.bf16.mxu1 %v2360_v23 }
 0xdb8   :  { %1909 = vmatpush3.bf16.msra.mxu1 %v1970_v59 }
 0xe7e   :  { %v1370_v17 = vpop.f32.mrb[32].mxu1 }
 0xe7f   :  { %v1371_v32 = vadd.f32 %v1718_v35, %v1370_v17  ;;  %v1892_v19 = vpop.f32.mrb[33].mxu1 }
 0xe80   :  { %v1373_v20 = vpop.f32.mrb[34].mxu1 }
 0xe81   :  { %v2803_v24 = vadd.f32 %v1371_v32, %v2632_v9  ;;  %v1374_v25 = vadd.f32 %v1718_v35, %v1373_v20  ;;  %v1893_v26 = vpop.f32.mrb[35].mxu1 }
 0xe83   :  { %v2806_v27 = vadd.f32 %v1374_v25, %v2630_v8  ;;  %v1381_v28 = vsel %vm281_vm0, %v2803_v24, 0.0 }
 0xe84   :  { %1382 = vadd.xlane.f32.xlu0 %v1381_v28 }
 0xe85   :  { %v1384_v29 = vsel %vm281_vm0, %v2806_v27, 0.0 }
 0xe86   :  { %1385 = vadd.xlane.f32.xlu1 %v1384_v29 }
 0xf11   :  { %v1383_v30 = vpop.xlane.xlu0 %1382 }
 0xf12   :  { %v1387_v31 = vmul.f32 0.03125, %v1383_v30 }
 0xf13   :  { %v1386_v33 = vpop.xlane.xlu1 %1385 }
 0xf14   :  { %v1389_v34 = vsub.f32 %v2803_v24, %v1387_v31  ;;  %v1388_v9 = vmul.f32 0.03125, %v1386_v33 }
 0xf16   :  { %v1390_v36 = vsub.f32 %v2806_v27, %v1388_v9  ;;  %v1391_v37 = vmul.f32 %v1389_v34, %v1389_v34 }
 0xf18   :  { %v1393_v8 = vsel %vm281_vm0, %v1391_v37, 0.0  ;;  %v1392_v38 = vmul.f32 %v1390_v36, %v1390_v36 }
 0xf19   :  { %1394 = vadd.xlane.f32.xlu0 %v1393_v8 }
 0xf1a   :  { %v1396_v39 = vsel %vm281_vm0, %v1392_v38, 0.0 }
 0xf1d   :  { %1397 = vadd.xlane.f32.xlu0 %v1396_v39 }
 0xfa6   :  { %v1395_v42 = vpop.xlane.xlu0 %1394 }
 0xfa7   :  { %v1399_v43 = vmul.f32 0.03125, %v1395_v42 }
 0xfa9   :  { %v1401_v44 = vadd.f32 1e-05, %v1399_v43 }
 0xfaa   :  { %v1398_v45 = vpop.xlane.xlu0 %1397 }
 0xfab   :  { %2007 = vrsqrt.f32 %v1401_v44  ;;  %v1400_v46 = vmul.f32 0.03125, %v1398_v45 }
 0xfad   :  { %v1402_v48 = vadd.f32 1e-05, %v1400_v46 }
 0xfaf   :  { %2009 = vrsqrt.f32 %v1402_v48 }
 0xfb5   :  { %v2008_v50 = vpop.eup %2007 }
 0xfb6   :  { %v1405_v47 = vmul.f32 %v2008_v50, %v1389_v34 }
 0xfb8   :  { %v1413_v22 = vmul.f32 %v1722_v18, %v1405_v47 }
 0xfb9   :  { %v2010_v21 = vpop.eup %2009 }
 0xfba   :  { %v1406_v49 = vmul.f32 %v2010_v21, %v1390_v36  ;;  %v1421_v53 = vadd.f32 %v1723_v51, %v1413_v22 }
 0xfbc   :  { %v1414_v52 = vmul.f32 %v1722_v18, %v1406_v49 }
 0xfbe   :  { %v1422_v54 = vadd.f32 %v1723_v51, %v1414_v52 }
 0xfc0   :  { %v1423_v55 = vpack.c.bf16 %v1422_v54, %v1421_v53 }
 0xfc2   :  { %1899 = vmatmul.mubr.msk.bf16.vlgmr.msra.gmra.mrb[36].mxu0 %vm281_vm0, %v1423_v55 }
0x1095   :  { %v1484_v61 = vpop.f32.mrb[36].mxu0 }
0x1096   :  { %v1485_v62 = vadd.f32 %v1724_v60, %v1484_v61  ;;  %v1900_v63 = vpop.f32.mrb[37].mxu0 }
0x1097   :  { %v1487_v0 = vpop.f32.mrb[38].mxu0 }
0x1098   :  { %v1493_v1 = vmul.f32 0.70710677, %v1485_v62  ;;  %v1488_v2 = vadd.f32 %v1724_v60, %v1487_v0  ;;  %v1901_v3 = vpop.f32.mrb[39].mxu0  ;;  %v1491_v10 = vmul.f32 0.5, %v1485_v62 }
0x109a   :  { %2011 = verf.f32 %v1493_v1  ;;  %v1494_v4 = vmul.f32 0.70710677, %v1488_v2  ;;  %v1492_v11 = vmul.f32 0.5, %v1488_v2 }
0x109c   :  { %2013 = verf.f32 %v1494_v4 }
0x10a4   :  { %v2012_v5 = vpop.eup %2011 }
0x10a5   :  { %v1497_v6 = vadd.f32 1.0, %v2012_v5 }
0x10a6   :  { %v2014_v7 = vpop.eup %2013 }
0x10a7   :  { %v1498_v12 = vadd.f32 1.0, %v2014_v7  ;;  %v1499_v23 = vmul.f32 %v1497_v6, %v1491_v10 }
0x10a9   :  { %v1500_v13 = vmul.f32 %v1498_v12, %v1492_v11 }
0x10ab   :  { %v1501_v14 = vpack.c.bf16 %v1500_v13, %v1499_v23 }
0x10ad   :  { %1911 = vmatmul.mubr.msk.bf16.vlgmr.msra.gmra.mrb[36].mxu1 %vm1541_vm6, %v1501_v14 }
0x1180   :  { %v1579_v16 = vpop.f32.mrb[36].mxu1 }
0x1181   :  { %v1580_v35 = vadd.f32 %v1728_v15, %v1579_v16  ;;  %v1912_v17 = vpop.f32.mrb[37].mxu1 }
0x1182   :  { %v1582_v32 = vpop.f32.mrb[38].mxu1 }
0x1183   :  { %v1588_v19 = vmul.f32 0.70710677, %v1580_v35  ;;  %v1583_v20 = vadd.f32 %v1728_v15, %v1582_v32  ;;  %v1913_v25 = vpop.f32.mrb[39].mxu1  ;;  %v1586_v29 = vmul.f32 0.5, %v1580_v35 }
0x1185   :  { %2015 = verf.f32 %v1588_v19  ;;  %v1589_v26 = vmul.f32 0.70710677, %v1583_v20  ;;  %v1587_v34 = vmul.f32 0.5, %v1583_v20 }
0x1187   :  { %2017 = verf.f32 %v1589_v26 }
0x118f   :  { %v2016_v28 = vpop.eup %2015 }
0x1190   :  { %v1592_v30 = vadd.f32 1.0, %v2016_v28 }
0x1191   :  { %v2018_v31 = vpop.eup %2017 }
0x1192   :  { %v1594_v33 = vmul.f32 %v1592_v30, %v1586_v29  ;;  %v1593_v9 = vadd.f32 1.0, %v2018_v31 }
0x1194   :  { %v1595_v36 = vmul.f32 %v1593_v9, %v1587_v34  ;;  %v1596_v37 = vadd.f32 %v1594_v33, %v2803_v24 }
0x1196   :  { %1598 = vxpose.xlu1.b32.start.end [1/1] (short) (narrow) %v1596_v37, 32  ;;  %v1597_v8 = vadd.f32 %v1595_v36, %v2806_v27 }
0x1198   :  { %1634 = vxpose.xlu0.b32.start.end [1/1] (short) (narrow) %v1597_v8, 32 }
0x1216   :  { %v1614_v38 = vpop.trf.xlu1 }
0x1217   :  { %1630 = vst.msk [vmem:[#allocation23] sm:$0xff] %vm401_vm2, %v1614_v38 }
0x1218   :  { %v1650_v39 = vpop.trf.xlu0 }
0x1219   :  { %1667 = vst.msk [vmem:[#allocation23 + $0x20] sm:$0xff] %vm401_vm2, %v1650_v39 }
0x121a   :  { %v1615_v40 = vpop.trf.xlu1 }
0x121b   :  { %1631 = vst.msk [vmem:[#allocation23 + $0x8] sm:$0xff] %vm401_vm2, %v1615_v40 }
0x121c   :  { %v1651_v41 = vpop.trf.xlu0 }
0x121d   :  { %1668 = vst.msk [vmem:[#allocation23 + $0x28] sm:$0xff] %vm401_vm2, %v1651_v41 }
0x121e   :  { %v1616_v42 = vpop.trf.xlu1 }
0x121f   :  { %1632 = vst.msk [vmem:[#allocation23 + $0x10] sm:$0xff] %vm401_vm2, %v1616_v42 }
0x1220   :  { %v1652_v24 = vpop.trf.xlu0 }
0x1221   :  { %1669 = vst.msk [vmem:[#allocation23 + $0x30] sm:$0xff] %vm401_vm2, %v1652_v24 }
0x1222   :  { %v1617_v27 = vpop.trf.xlu1 }
0x1223   :  { %1633 = vst.msk [vmem:[#allocation23 + $0x18] sm:$0xff] %vm401_vm2, %v1617_v27 }
0x1224   :  { %v1653_v43 = vpop.trf.xlu0 }
0x1225   :  { %1670 = vst.msk [vmem:[#allocation23 + $0x38] sm:$0xff] %vm401_vm2, %v1653_v43 }
0x1226   :  { %2316 = shalt.err (!%p2313_p10)
}
0x1227   :  { %s2317_s3 = scalar_lea.hbm %s2859_s13, 1024 }
0x1228   :  { %p2318_p11 = scmp.ne.s32.totalorder %s2859_s13, %s2317_s3  ;;  %p2321_p12 = scmp.lt.u32.totalorder %s2317_s3, %s2859_s13 }
0x122a   :  { %p2323_p13 = pnand %p2321_p12, %p2318_p11 }
0x122c   :  { %2326 = shalt.err (!%p2323_p13)
}
0x122d   :  { %1682 = dma.vmem_to_hbm [thread:$0]  %s1677_s8, 1024, %s2859_s13, [#allocation4], %s2352_s11, %s2352_s11, %s2353_s26  }
0x122e   :  { %2341 = dma.done.wait [#allocation4], 1024  }
0x122f   :  { %2342 = vsyncadd [#allocation4], 4294966272 }
0x1230   :  { %1686 = vsyncpa [#allocation3], 1 }
0x1231   :  { %1687 = vsyncpa [#allocation6], 1 }
0x1232   :  { %1688 = vsyncpa [#allocation9], 1 }
0x1233   :  { %1689 = vsyncpa [#allocation12], 1 }
0x1234   :  { %1690 = vsyncpa [#allocation15], 1 }
0x1235   :  { %1691 = vsyncpa [#allocation18], 1 }
0x1236   :  { %1692 = vsyncpa [#allocation21], 1 }
0x1237   :  { %1693 = vsyncpa [#allocation4], 1 }

</bundles_post_ra>
